<compile_context>
chip_gen: v7x
topology: tpu7x:2x2x1
jax: 0.10.0
libtpu: 0.0.40
codegen_flags: <defaults>
</compile_context>

<pallas_src>
import jax
import jax.numpy as jnp
from jax import lax
from jax.experimental import pallas as pl
from jax.experimental.pallas import tpu as pltpu


def _round_up(x, m):
    return ((x + m - 1) // m) * m


def _vmem_estimate(TH, W, Wp, Cin_p, Cout_p, KH=3, KW=3):
    """Rough per-step VMEM footprint (double-buffered blocks + scratch/temps)."""
    bf, f32 = 2, 4
    xm = TH * Wp * Cin_p * bf                    # main input block
    xh = (KH - 1) * Wp * Cin_p * bf              # halo input block
    out = TH * W * Cout_p * f32                  # output block
    wgt = KH * KW * Cin_p * Cout_p * bf          # weights
    xwin = (TH + KH - 1) * Wp * Cin_p * bf       # assembled window scratch
    acc = TH * Wp * Cout_p * f32                 # accumulator scratch
    partial = TH * Wp * Cout_p * f32             # per-kw tap partial
    return 2 * (xm + xh + out + wgt) + xwin + acc + 2 * partial


def _pick_tile_rows(H, W, Wp, Cin_p, Cout_p, budget_bytes=10 * 1024 * 1024):
    """Largest row-tile (multiple of 8, <= rounded H) that fits the budget."""
    cap = min(256, _round_up(H, 8))
    best, th = 8, 8
    while th <= cap:
        if _vmem_estimate(th, W, Wp, Cin_p, Cout_p) <= budget_bytes:
            best = th
        th += 8
    return best


def _conv_relu_kernel(xm_ref, xh_ref, w_ref, o_ref, xwin_ref, acc_ref):
    """One (batch, row-block) tile of 3x3 / stride-1 / pad-1 conv + ReLU.

    xm_ref  : (1, TH,   Wp, Cin_p)  bf16  main rows of the padded input window
    xh_ref  : (1, KH-1, Wp, Cin_p)  bf16  halo rows directly below
    w_ref   : (KH, KW, Cin_p, Cout_p) bf16
    o_ref   : (1, TH, W, Cout_p)    output dtype
    xwin_ref: (TH+KH-1, Wp, Cin_p)  bf16 VMEM scratch (assembled window)
    acc_ref : (TH*Wp, Cout_p)       f32  VMEM scratch (accumulator)
    """
    TH, Wp = xm_ref.shape[1], xm_ref.shape[2]
    KH, KW, Cin_p, Cout_p = w_ref.shape
    W = o_ref.shape[2]
    M = TH * Wp

    # Assemble the halo'd window once (whole-plane stores, no relayout), then
    # view it as 2-D: Wp is a multiple of 16, so the reshape is layout-clean.
    xwin_ref[0:TH] = xm_ref[0]
    xwin_ref[TH:TH + KH - 1] = xh_ref[0]
    xf = xwin_ref[...].reshape((TH + KH - 1) * Wp, Cin_p)

    # Per-kh LHS slabs: aligned (multiple-of-Wp) sublane slices, reused for all kw.
    slabs = [xf[kh * Wp:(kh + TH) * Wp, :] for kh in range(KH)]

    for kw in range(KW):
        partial = jnp.dot(slabs[0], w_ref[0, kw],
                          preferred_element_type=jnp.float32)
        for kh in range(1, KH):
            partial += jnp.dot(slabs[kh], w_ref[kh, kw],
                               preferred_element_type=jnp.float32)
        if kw:
            # Shift tap kw left by kw columns via an XLU roll (no misaligned
            # slice).  Wrap-around rows only land in discarded columns >= W.
            partial = pltpu.roll(partial, shift=M - kw, axis=0)
        if kw == 0:
            acc_ref[...] = partial
        else:
            acc_ref[...] += partial

    acc = acc_ref[...].reshape(TH, Wp, Cout_p)
    o_ref[0] = jnp.maximum(acc[:, :W, :], 0.0).astype(o_ref.dtype)


def conv_relu(x_nchw, weight, *, stride=1, padding=1, dilation=1,
              compute_dtype=jnp.bfloat16):
    """Forward of ConvReLU. x_nchw: (B, Cin, H, W); weight: (Cout, Cin, 3, 3)."""
    assert stride == 1 and dilation == 1 and padding == 1, \
        "kernel specialized to 3x3, stride=1, padding=1, dilation=1"
    B, Cin, H, W = x_nchw.shape
    Cout, Cin_w, KH, KW = weight.shape
    assert Cin == Cin_w and KH == 3 and KW == 3

    LANE = 128
    Cin_p = _round_up(Cin, LANE)
    Cout_p = _round_up(Cout, LANE)
    Wp = _round_up(W + (KW - 1), 16)          # halo + sublane/bf16-pack alignment
    TH = _pick_tile_rows(H, W, Wp, Cin_p, Cout_p)
    H_pad = _round_up(H, TH)
    Hp = H_pad + (KH - 1)
    R = H_pad // TH
    out_dtype = x_nchw.dtype

    # ---- wrapper glue: one fused pad (spatial halo + channel pad) + bf16 cast.
    # TODO(synk): keep activations NHWC end-to-end in the surrounding model to
    # drop the two full-HBM NCHW<->NHWC transpose passes below.
    x_nhwc = jnp.transpose(x_nchw, (0, 2, 3, 1))                     # (B,H,W,Cin)
    x_pad = jnp.pad(
        x_nhwc,
        ((0, 0),
         (padding, Hp - H - padding),
         (padding, Wp - W - padding),
         (0, Cin_p - Cin)),
    ).astype(compute_dtype)                                          # (B,Hp,Wp,Cin_p)
    w_p = jnp.pad(
        jnp.transpose(weight, (2, 3, 1, 0)),                         # (KH,KW,Cin,Cout)
        ((0, 0), (0, 0), (0, Cin_p - Cin), (0, Cout_p - Cout)),
    ).astype(compute_dtype)                                          # (KH,KW,Cin_p,Cout_p)

    est = _vmem_estimate(TH, W, Wp, Cin_p, Cout_p, KH, KW)
    vmem_limit = int(min(32 * 2**20, max(16 * 2**20, 4 * est)))
    half_th = TH // 2  # halo blocks are 2 rows; TH is even (multiple of 8)

    out_full = pl.pallas_call(
        _conv_relu_kernel,
        out_shape=jax.ShapeDtypeStruct((B, H_pad, W, Cout_p), out_dtype),
        grid_spec=pltpu.PrefetchScalarGridSpec(
            num_scalar_prefetch=0,
            grid=(B, R),
            in_specs=[
                # main TH rows of the padded input for this row block
                pl.BlockSpec((1, TH, Wp, Cin_p), lambda b, r: (b, r, 0, 0)),
                # 2-row halo directly below (same array, 2-row blocking)
                pl.BlockSpec((1, KH - 1, Wp, Cin_p),
                             lambda b, r: (b, (r + 1) * half_th, 0, 0)),
                # full weights, resident across the grid
                pl.BlockSpec((KH, KW, Cin_p, Cout_p), lambda b, r: (0, 0, 0, 0)),
            ],
            out_specs=pl.BlockSpec((1, TH, W, Cout_p), lambda b, r: (b, r, 0, 0)),
            scratch_shapes=[
                pltpu.VMEM((TH + KH - 1, Wp, Cin_p), compute_dtype),
                pltpu.VMEM((TH * Wp, Cout_p), jnp.float32),
            ],
        ),
        compiler_params=pltpu.CompilerParams(
            dimension_semantics=("parallel", "parallel"),
            vmem_limit_bytes=vmem_limit,
        ),
        cost_estimate=pl.CostEstimate(
            flops=2 * B * H_pad * Wp * KH * KW * Cin_p * Cout_p,
            transcendentals=0,
            bytes_accessed=(x_pad.size * x_pad.dtype.itemsize
                            + w_p.size * w_p.dtype.itemsize
                            + B * H_pad * W * Cout_p
                            * jnp.dtype(out_dtype).itemsize),
        ),
    )(x_pad, x_pad, w_p)

    out = out_full[:, :H, :, :Cout]                 # drop row / channel padding
    return jnp.transpose(out, (0, 3, 1, 2))         # back to NCHW


if __name__ == "__main__":
    key = jax.random.PRNGKey(0)
    k_x, k_w = jax.random.split(key)

    B, Cin, Cout, H, W = 2, 4, 8, 16, 16
    KH = KW = 3

    x = jax.random.normal(k_x, (B, Cin, H, W), dtype=jnp.float32)
    # Deterministic synthetic weights (nn.Conv2d(in, out, 3, bias=False) shape).
    weight = jax.random.normal(k_w, (Cout, Cin, KH, KW), dtype=jnp.float32) * 0.1

    out = jax.jit(conv_relu)(x, weight)
    out = jax.block_until_ready(out)

    # Reference with the same bf16-rounded operands (matching the MXU operand
    # precision) and f32 accumulation, then ReLU.
    x_b = x.astype(jnp.bfloat16).astype(jnp.float32)
    w_b = weight.astype(jnp.bfloat16).astype(jnp.float32)
    ref = lax.conv_general_dilated(
        x_b, w_b, window_strides=(1, 1), padding=((1, 1), (1, 1)),
        dimension_numbers=("NCHW", "OIHW", "NCHW"),
        preferred_element_type=jnp.float32,
    )
    ref = jnp.maximum(ref, 0.0)

    assert out.shape == (B, Cout, H, W)
    assert out.dtype == x.dtype
    assert jnp.allclose(out, ref, atol=5e-3, rtol=5e-3), \
        float(jnp.max(jnp.abs(out - ref)))

    print("KERNEL_OK")
</pallas_src>

<mosaic_0001>
module attributes {stable_mosaic.version = 11 : i64} {
  func.func @_conv_relu_kernel(%arg0: i32, %arg1: i32, %arg2: memref<1x16x32x128xbf16, #tpu.memory_space<vmem>>, %arg3: memref<1x2x32x128xbf16, #tpu.memory_space<vmem>>, %arg4: memref<3x3x128x128xbf16, #tpu.memory_space<vmem>>, %arg5: memref<1x16x16x128xf32, #tpu.memory_space<vmem>>, %arg6: memref<18x32x128xbf16, #tpu.memory_space<vmem>>, %arg7: memref<512x128xf32, #tpu.memory_space<vmem>>) attributes {dimension_semantics = [#tpu.dimension_semantics<parallel>, #tpu.dimension_semantics<parallel>], iteration_bounds = array<i64: 2, 1>, scalar_prefetch = 0 : i64, scratch_operands = 2 : i64, tpu.core_type = #tpu.core_type<tc>, window_params = [{transform_indices = @transform_0, window_bounds = array<i64: 1, 16, 32, 128>}, {transform_indices = @transform_1, window_bounds = array<i64: 1, 2, 32, 128>}, {pipeline_mode = #tpu.pipeline_mode<synchronous>, transform_indices = @transform_2, window_bounds = array<i64: 3, 3, 128, 128>}, {transform_indices = @transform_3, window_bounds = array<i64: 1, 16, 16, 128>}]} {
    %c0 = arith.constant 0 : index
    %c0_0 = arith.constant 0 : index
    %c0_1 = arith.constant 0 : index
    %c0_2 = arith.constant 0 : index
    %0 = vector.load %arg2[%c0, %c0_0, %c0_1, %c0_2] : memref<1x16x32x128xbf16, #tpu.memory_space<vmem>>, vector<1x16x32x128xbf16>
    %1 = vector.shape_cast %0 : vector<1x16x32x128xbf16> to vector<16x32x128xbf16>
    %c0_3 = arith.constant 0 : index
    %c0_4 = arith.constant 0 : index
    %c0_5 = arith.constant 0 : index
    %2 = vector.load %arg6[%c0_3, %c0_4, %c0_5] : memref<18x32x128xbf16, #tpu.memory_space<vmem>>, vector<16x32x128xbf16>
    tpu.vector_store %arg6[%c0_3, %c0_4, %c0_5], %1 {strides = array<i32>} : memref<18x32x128xbf16, #tpu.memory_space<vmem>>, vector<16x32x128xbf16>,
    %c0_6 = arith.constant 0 : index
    %c0_7 = arith.constant 0 : index
    %c0_8 = arith.constant 0 : index
    %c0_9 = arith.constant 0 : index
    %3 = vector.load %arg3[%c0_6, %c0_7, %c0_8, %c0_9] : memref<1x2x32x128xbf16, #tpu.memory_space<vmem>>, vector<1x2x32x128xbf16>
    %4 = vector.shape_cast %3 : vector<1x2x32x128xbf16> to vector<2x32x128xbf16>
    %c16 = arith.constant 16 : index
    %c0_10 = arith.constant 0 : index
    %c0_11 = arith.constant 0 : index
    %5 = vector.load %arg6[%c16, %c0_10, %c0_11] : memref<18x32x128xbf16, #tpu.memory_space<vmem>>, vector<2x32x128xbf16>
    tpu.vector_store %arg6[%c16, %c0_10, %c0_11], %4 {strides = array<i32>} : memref<18x32x128xbf16, #tpu.memory_space<vmem>>, vector<2x32x128xbf16>,
    %c0_12 = arith.constant 0 : index
    %c0_13 = arith.constant 0 : index
    %c0_14 = arith.constant 0 : index
    %6 = vector.load %arg6[%c0_12, %c0_13, %c0_14] : memref<18x32x128xbf16, #tpu.memory_space<vmem>>, vector<18x32x128xbf16>
    %7 = vector.shape_cast %6 : vector<18x32x128xbf16> to vector<576x128xbf16>
    %8 = vector.extract_strided_slice %7 {offsets = [0, 0], sizes = [512, 128], strides = [1, 1]} : vector<576x128xbf16> to vector<512x128xbf16>
    %9 = vector.extract_strided_slice %7 {offsets = [32, 0], sizes = [512, 128], strides = [1, 1]} : vector<576x128xbf16> to vector<512x128xbf16>
    %10 = vector.extract_strided_slice %7 {offsets = [64, 0], sizes = [512, 128], strides = [1, 1]} : vector<576x128xbf16> to vector<512x128xbf16>
    %c0_15 = arith.constant 0 : index
    %c0_16 = arith.constant 0 : index
    %c0_17 = arith.constant 0 : index
    %c0_18 = arith.constant 0 : index
    %11 = vector.load %arg4[%c0_15, %c0_16, %c0_17, %c0_18] : memref<3x3x128x128xbf16, #tpu.memory_space<vmem>>, vector<1x1x128x128xbf16>
    %12 = vector.shape_cast %11 : vector<1x1x128x128xbf16> to vector<128x128xbf16>
    %cst = arith.constant dense<0.000000e+00> : vector<512x128xf32>
    %13 = tpu.matmul %8, %12, %cst {dimension_numbers = #tpu.dot_dimension_numbers<[1], [0], [0], [1], [0, 0, 1, 1], [], []>} : vector<512x128xbf16>, vector<128x128xbf16>, vector<512x128xf32> -> vector<512x128xf32>
    %c1 = arith.constant 1 : index
    %c0_19 = arith.constant 0 : index
    %c0_20 = arith.constant 0 : index
    %c0_21 = arith.constant 0 : index
    %14 = vector.load %arg4[%c1, %c0_19, %c0_20, %c0_21] : memref<3x3x128x128xbf16, #tpu.memory_space<vmem>>, vector<1x1x128x128xbf16>
    %15 = vector.shape_cast %14 : vector<1x1x128x128xbf16> to vector<128x128xbf16>
    %cst_22 = arith.constant dense<0.000000e+00> : vector<512x128xf32>
    %16 = tpu.matmul %9, %15, %cst_22 {dimension_numbers = #tpu.dot_dimension_numbers<[1], [0], [0], [1], [0, 0, 1, 1], [], []>} : vector<512x128xbf16>, vector<128x128xbf16>, vector<512x128xf32> -> vector<512x128xf32>
    %17 = arith.addf %13, %16 : vector<512x128xf32>
    %c2 = arith.constant 2 : index
    %c0_23 = arith.constant 0 : index
    %c0_24 = arith.constant 0 : index
    %c0_25 = arith.constant 0 : index
    %18 = vector.load %arg4[%c2, %c0_23, %c0_24, %c0_25] : memref<3x3x128x128xbf16, #tpu.memory_space<vmem>>, vector<1x1x128x128xbf16>
    %19 = vector.shape_cast %18 : vector<1x1x128x128xbf16> to vector<128x128xbf16>
    %cst_26 = arith.constant dense<0.000000e+00> : vector<512x128xf32>
    %20 = tpu.matmul %10, %19, %cst_26 {dimension_numbers = #tpu.dot_dimension_numbers<[1], [0], [0], [1], [0, 0, 1, 1], [], []>} : vector<512x128xbf16>, vector<128x128xbf16>, vector<512x128xf32> -> vector<512x128xf32>
    %21 = arith.addf %17, %20 : vector<512x128xf32>
    %c0_27 = arith.constant 0 : index
    %c0_28 = arith.constant 0 : index
    %22 = vector.load %arg7[%c0_27, %c0_28] : memref<512x128xf32, #tpu.memory_space<vmem>>, vector<512x128xf32>
    tpu.vector_store %arg7[%c0_27, %c0_28], %21 {strides = array<i32>} : memref<512x128xf32, #tpu.memory_space<vmem>>, vector<512x128xf32>,
    %c0_29 = arith.constant 0 : index
    %c1_30 = arith.constant 1 : index
    %c0_31 = arith.constant 0 : index
    %c0_32 = arith.constant 0 : index
    %23 = vector.load %arg4[%c0_29, %c1_30, %c0_31, %c0_32] : memref<3x3x128x128xbf16, #tpu.memory_space<vmem>>, vector<1x1x128x128xbf16>
    %24 = vector.shape_cast %23 : vector<1x1x128x128xbf16> to vector<128x128xbf16>
    %cst_33 = arith.constant dense<0.000000e+00> : vector<512x128xf32>
    %25 = tpu.matmul %8, %24, %cst_33 {dimension_numbers = #tpu.dot_dimension_numbers<[1], [0], [0], [1], [0, 0, 1, 1], [], []>} : vector<512x128xbf16>, vector<128x128xbf16>, vector<512x128xf32> -> vector<512x128xf32>
    %c1_34 = arith.constant 1 : index
    %c1_35 = arith.constant 1 : index
    %c0_36 = arith.constant 0 : index
    %c0_37 = arith.constant 0 : index
    %26 = vector.load %arg4[%c1_34, %c1_35, %c0_36, %c0_37] : memref<3x3x128x128xbf16, #tpu.memory_space<vmem>>, vector<1x1x128x128xbf16>
    %27 = vector.shape_cast %26 : vector<1x1x128x128xbf16> to vector<128x128xbf16>
    %cst_38 = arith.constant dense<0.000000e+00> : vector<512x128xf32>
    %28 = tpu.matmul %9, %27, %cst_38 {dimension_numbers = #tpu.dot_dimension_numbers<[1], [0], [0], [1], [0, 0, 1, 1], [], []>} : vector<512x128xbf16>, vector<128x128xbf16>, vector<512x128xf32> -> vector<512x128xf32>
    %29 = arith.addf %25, %28 : vector<512x128xf32>
    %c2_39 = arith.constant 2 : index
    %c1_40 = arith.constant 1 : index
    %c0_41 = arith.constant 0 : index
    %c0_42 = arith.constant 0 : index
    %30 = vector.load %arg4[%c2_39, %c1_40, %c0_41, %c0_42] : memref<3x3x128x128xbf16, #tpu.memory_space<vmem>>, vector<1x1x128x128xbf16>
    %31 = vector.shape_cast %30 : vector<1x1x128x128xbf16> to vector<128x128xbf16>
    %cst_43 = arith.constant dense<0.000000e+00> : vector<512x128xf32>
    %32 = tpu.matmul %10, %31, %cst_43 {dimension_numbers = #tpu.dot_dimension_numbers<[1], [0], [0], [1], [0, 0, 1, 1], [], []>} : vector<512x128xbf16>, vector<128x128xbf16>, vector<512x128xf32> -> vector<512x128xf32>
    %33 = arith.addf %29, %32 : vector<512x128xf32>
    %c511_i32 = arith.constant 511 : i32
    %34 = tpu.dynamic_rotate %33 by %c511_i32 dim 0 : vector<512x128xf32>, i32 -> vector<512x128xf32>
    %c0_44 = arith.constant 0 : index
    %c0_45 = arith.constant 0 : index
    %35 = vector.load %arg7[%c0_44, %c0_45] : memref<512x128xf32, #tpu.memory_space<vmem>>, vector<512x128xf32>
    %36 = arith.addf %35, %34 : vector<512x128xf32>
    %c0_46 = arith.constant 0 : index
    %c0_47 = arith.constant 0 : index
    %37 = vector.load %arg7[%c0_46, %c0_47] : memref<512x128xf32, #tpu.memory_space<vmem>>, vector<512x128xf32>
    tpu.vector_store %arg7[%c0_46, %c0_47], %36 {strides = array<i32>} : memref<512x128xf32, #tpu.memory_space<vmem>>, vector<512x128xf32>,
    %c0_48 = arith.constant 0 : index
    %c2_49 = arith.constant 2 : index
    %c0_50 = arith.constant 0 : index
    %c0_51 = arith.constant 0 : index
    %38 = vector.load %arg4[%c0_48, %c2_49, %c0_50, %c0_51] : memref<3x3x128x128xbf16, #tpu.memory_space<vmem>>, vector<1x1x128x128xbf16>
    %39 = vector.shape_cast %38 : vector<1x1x128x128xbf16> to vector<128x128xbf16>
    %cst_52 = arith.constant dense<0.000000e+00> : vector<512x128xf32>
    %40 = tpu.matmul %8, %39, %cst_52 {dimension_numbers = #tpu.dot_dimension_numbers<[1], [0], [0], [1], [0, 0, 1, 1], [], []>} : vector<512x128xbf16>, vector<128x128xbf16>, vector<512x128xf32> -> vector<512x128xf32>
    %c1_53 = arith.constant 1 : index
    %c2_54 = arith.constant 2 : index
    %c0_55 = arith.constant 0 : index
    %c0_56 = arith.constant 0 : index
    %41 = vector.load %arg4[%c1_53, %c2_54, %c0_55, %c0_56] : memref<3x3x128x128xbf16, #tpu.memory_space<vmem>>, vector<1x1x128x128xbf16>
    %42 = vector.shape_cast %41 : vector<1x1x128x128xbf16> to vector<128x128xbf16>
    %cst_57 = arith.constant dense<0.000000e+00> : vector<512x128xf32>
    %43 = tpu.matmul %9, %42, %cst_57 {dimension_numbers = #tpu.dot_dimension_numbers<[1], [0], [0], [1], [0, 0, 1, 1], [], []>} : vector<512x128xbf16>, vector<128x128xbf16>, vector<512x128xf32> -> vector<512x128xf32>
    %44 = arith.addf %40, %43 : vector<512x128xf32>
    %c2_58 = arith.constant 2 : index
    %c2_59 = arith.constant 2 : index
    %c0_60 = arith.constant 0 : index
    %c0_61 = arith.constant 0 : index
    %45 = vector.load %arg4[%c2_58, %c2_59, %c0_60, %c0_61] : memref<3x3x128x128xbf16, #tpu.memory_space<vmem>>, vector<1x1x128x128xbf16>
    %46 = vector.shape_cast %45 : vector<1x1x128x128xbf16> to vector<128x128xbf16>
    %cst_62 = arith.constant dense<0.000000e+00> : vector<512x128xf32>
    %47 = tpu.matmul %10, %46, %cst_62 {dimension_numbers = #tpu.dot_dimension_numbers<[1], [0], [0], [1], [0, 0, 1, 1], [], []>} : vector<512x128xbf16>, vector<128x128xbf16>, vector<512x128xf32> -> vector<512x128xf32>
    %48 = arith.addf %44, %47 : vector<512x128xf32>
    %c510_i32 = arith.constant 510 : i32
    %49 = tpu.dynamic_rotate %48 by %c510_i32 dim 0 : vector<512x128xf32>, i32 -> vector<512x128xf32>
    %c0_63 = arith.constant 0 : index
    %c0_64 = arith.constant 0 : index
    %50 = vector.load %arg7[%c0_63, %c0_64] : memref<512x128xf32, #tpu.memory_space<vmem>>, vector<512x128xf32>
    %51 = arith.addf %50, %49 : vector<512x128xf32>
    %c0_65 = arith.constant 0 : index
    %c0_66 = arith.constant 0 : index
    %52 = vector.load %arg7[%c0_65, %c0_66] : memref<512x128xf32, #tpu.memory_space<vmem>>, vector<512x128xf32>
    tpu.vector_store %arg7[%c0_65, %c0_66], %51 {strides = array<i32>} : memref<512x128xf32, #tpu.memory_space<vmem>>, vector<512x128xf32>,
    %c0_67 = arith.constant 0 : index
    %c0_68 = arith.constant 0 : index
    %53 = vector.load %arg7[%c0_67, %c0_68] : memref<512x128xf32, #tpu.memory_space<vmem>>, vector<512x128xf32>
    %54 = vector.shape_cast %53 : vector<512x128xf32> to vector<16x32x128xf32>
    %55 = vector.extract_strided_slice %54 {offsets = [0, 0, 0], sizes = [16, 16, 128], strides = [1, 1, 1]} : vector<16x32x128xf32> to vector<16x16x128xf32>
    %cst_69 = arith.constant 0.000000e+00 : f32
    %56 = vector.broadcast %cst_69 : f32 to vector<16x16x128xf32>
    %57 = arith.maximumf %55, %56 : vector<16x16x128xf32>
    %c0_70 = arith.constant 0 : index
    %c0_71 = arith.constant 0 : index
    %c0_72 = arith.constant 0 : index
    %c0_73 = arith.constant 0 : index
    %58 = vector.load %arg5[%c0_70, %c0_71, %c0_72, %c0_73] : memref<1x16x16x128xf32, #tpu.memory_space<vmem>>, vector<1x16x16x128xf32>
    %59 = vector.shape_cast %58 : vector<1x16x16x128xf32> to vector<16x16x128xf32>
    %60 = vector.shape_cast %57 : vector<16x16x128xf32> to vector<1x16x16x128xf32>
    tpu.vector_store %arg5[%c0_70, %c0_71, %c0_72, %c0_73], %60 {strides = array<i32>} : memref<1x16x16x128xf32, #tpu.memory_space<vmem>>, vector<1x16x16x128xf32>,
    return
  }
  func.func @transform_0(%arg0: i32, %arg1: i32) -> (i32, i32, i32, i32) {
    %c0_i32 = arith.constant 0 : i32
    %c0_i32_0 = arith.constant 0 : i32
    %c0_i32_1 = arith.constant 0 : i32
    return %arg0, %arg1, %c0_i32, %c0_i32_0 : i32, i32, i32, i32
  }
  func.func @transform_1(%arg0: i32, %arg1: i32) -> (i32, i32, i32, i32) {
    %c1_i32 = arith.constant 1 : i32
    %0 = arith.addi %arg1, %c1_i32 : i32
    %c8_i32 = arith.constant 8 : i32
    %1 = arith.muli %0, %c8_i32 : i32
    %c0_i32 = arith.constant 0 : i32
    %c0_i32_0 = arith.constant 0 : i32
    %c0_i32_1 = arith.constant 0 : i32
    return %arg0, %1, %c0_i32, %c0_i32_0 : i32, i32, i32, i32
  }
  func.func @transform_2(%arg0: i32, %arg1: i32) -> (i32, i32, i32, i32) {
    %c0_i32 = arith.constant 0 : i32
    %c0_i32_0 = arith.constant 0 : i32
    %c0_i32_1 = arith.constant 0 : i32
    %c0_i32_2 = arith.constant 0 : i32
    %c0_i32_3 = arith.constant 0 : i32
    return %c0_i32, %c0_i32_0, %c0_i32_1, %c0_i32_2 : i32, i32, i32, i32
  }
  func.func @transform_3(%arg0: i32, %arg1: i32) -> (i32, i32, i32, i32) {
    %c0_i32 = arith.constant 0 : i32
    %c0_i32_0 = arith.constant 0 : i32
    %c0_i32_1 = arith.constant 0 : i32
    return %arg0, %arg1, %c0_i32, %c0_i32_0 : i32, i32, i32, i32
  }
}

</mosaic_0001>

<bundles_post_ra>
// kernel: conv_relu.1
= control target key start
LH: loop header
LB: loop body
LE: loop exit
PB: predicated region body
PF: predicated region fallthrough
CT: control target
= control target key end

     0   :  { %s6768_s12 = smov 0   ;;  %s6770_s13 = smov 0   ;;  %s7830_s0 = inlined_call_operand.vmem [shape: bf16[2,18,32,128], index: 0, kind: input, shape index: {}, may-alias: {0,1}]   ;;  %s7831_s1 = inlined_call_operand.vmem [shape: bf16[2,18,32,128], index: 1, kind: input, shape index: {}, may-alias: {0,1}]   ;;  %s7832_s2 = inlined_call_operand.vmem [shape: bf16[3,3,128,128], index: 2, kind: input, shape index: {}]   ;;  %s7833_s3 = inlined_call_operand.vmem [shape: f32[2,16,16,128], index: 3, kind: output, shape index: {}]  }
   0x1   :  { %s6772_s14 = smov 0  }
   0x2 LB: > { %s25_s15 = sadd.s32 1, %s6742_s13  ;;  %p4957_p0 = scmp.ge.s32.totalorder %s6746_s14, 1  ;;  %s6746_s14 = sphi %s6772_s14, %s13_s14   ;;  %s6742_s13 = sphi %s6770_s13, %s7835_s13   ;;  %s6738_s12 = sphi %s6768_s12, %s7834_s12  }
   0x3   : > { %p27_p1 = scmp.ge.s32.totalorder %s25_s15, 2  ;;  %p195_p2 = scmp.lt.s32.totalorder %s6746_s14, 3 }
   0x5   : > { %s7837_s15 = smov (%p27_p1, %s25_s15), 0  ;;  %p196_p3 = pnand %p4957_p0, %p195_p2 }
   0x6   : > { %v6582_v0 = vld [vmem:[%s7832_s2 + $0xc0] sm:$0xff] (!%p196_p3)   ;;  %p252_p4 = scmp.lt.s32.totalorder (!%p196_p3), %s6738_s12, 1  ;;  %v6583_v1 = vld [vmem:[%s7832_s2 + $0xc8] sm:$0xff] (!%p196_p3)   ;;  %v6584_v2 = vld [vmem:[%s7832_s2 + $0xd0] sm:$0xff] (!%p196_p3)  }
   0x7   : > { %199 = sbr.rel (%p196_p3) target bundleno = 833 (0x341), region = 32  ;;  %5563 = vmatprep.subr.bf16.mxu0 (!%p196_p3), %v6582_v0  ;;  %6283 = vmatprep.subr.bf16.mxu1 (!%p196_p3), %v6582_v0  ;;  %v6585_v3 = vld [vmem:[%s7832_s2 + $0xd8] sm:$0xff] (!%p196_p3)   ;;  %v6586_v6 = vld [vmem:[%s7832_s2 + $0xe0] sm:$0xff] (!%p196_p3)   ;;  %v6587_v7 = vld [vmem:[%s7832_s2 + $0xe8] sm:$0xff] (!%p196_p3)  }
   0x8   : > { %5564 = vmatpush3.bf16.msra.mxu0 (!%p196_p3), %v6582_v0  ;;  %6291 = vmatpush3.bf16.msra.mxu1 (!%p196_p3), %v6582_v0  ;;  %v6588_v8 = vld [vmem:[%s7832_s2 + $0xf0] sm:$0xff] (!%p196_p3)   ;;  %v6589_v9 = vld [vmem:[%s7832_s2 + $0xf8] sm:$0xff] (!%p196_p3)   ;;  %v6594_v10 = vld [vmem:[%s7832_s2] sm:$0xff] (!%p196_p3)  }
   0x9   : > { %5565 = vmatprep.subr.bf16.mxu0 (!%p196_p3), %v6583_v1  ;;  %6284 = vmatprep.subr.bf16.mxu1 (!%p196_p3), %v6583_v1  ;;  %v6595_v12 = vld [vmem:[%s7832_s2 + $0x180] sm:$0xff] (!%p196_p3)   ;;  %v6600_v16 = vld [vmem:[%s7832_s2 + $0x8] sm:$0xff] (!%p196_p3)   ;;  %v6606_v18 = vld [vmem:[%s7832_s2 + $0x10] sm:$0xff] (!%p196_p3)  }
   0xa   : > { %v6601_v17 = vld [vmem:[%s7832_s2 + $0x188] sm:$0xff] (!%p196_p3)   ;;  %v6607_v20 = vld [vmem:[%s7832_s2 + $0x190] sm:$0xff] (!%p196_p3)   ;;  %v6612_v24 = vld [vmem:[%s7832_s2 + $0x18] sm:$0xff] (!%p196_p3)  }
   0xb   : > { %v6613_v25 = vld [vmem:[%s7832_s2 + $0x198] sm:$0xff] (!%p196_p3)   ;;  %v6618_v28 = vld [vmem:[%s7832_s2 + $0x20] sm:$0xff] (!%p196_p3)   ;;  %v6624_v32 = vld [vmem:[%s7832_s2 + $0x28] sm:$0xff] (!%p196_p3)  }
   0xc   : > { %5566 = vmatpush3.bf16.msra.mxu0 (!%p196_p3), %v6583_v1  ;;  %6292 = vmatpush3.bf16.msra.mxu1 (!%p196_p3), %v6583_v1  ;;  %v6619_v29 = vld [vmem:[%s7832_s2 + $0x1a0] sm:$0xff] (!%p196_p3)   ;;  %v6625_v33 = vld [vmem:[%s7832_s2 + $0x1a8] sm:$0xff] (!%p196_p3)   ;;  %v6630_v36 = vld [vmem:[%s7832_s2 + $0x30] sm:$0xff] (!%p196_p3)  }
   0xd   : > { %5567 = vmatprep.subr.bf16.mxu0 (!%p196_p3), %v6584_v2  ;;  %6285 = vmatprep.subr.bf16.mxu1 (!%p196_p3), %v6584_v2  ;;  %v6631_v37 = vld [vmem:[%s7832_s2 + $0x1b0] sm:$0xff] (!%p196_p3)   ;;  %v6636_v40 = vld [vmem:[%s7832_s2 + $0x38] sm:$0xff] (!%p196_p3)   ;;  %v6640_v44 = vld [vmem:[%s7832_s2 + $0x100] sm:$0xff] (!%p196_p3)  }
   0xe   : > { %s7839_s12 = smov (!%p252_p4, %s6738_s12), 1  ;;  %v6637_v41 = vld [vmem:[%s7832_s2 + $0x1b8] sm:$0xff]   ;;  %v6641_v45 = vld [vmem:[%s7832_s2 + $0x140] sm:$0xff]   ;;  %v6642_v60 = vld [vmem:[%s7832_s2 + $0x108] sm:$0xff]  }
   0xf   : > { %s6555_s22 = smul.u32 288, %s7839_s12  ;;  %v6643_v61 = vld [vmem:[%s7832_s2 + $0x148] sm:$0xff]   ;;  %v6644_v62 = vld [vmem:[%s7832_s2 + $0x110] sm:$0xff]   ;;  %v6646_v0 = vld [vmem:[%s7832_s2 + $0x118] sm:$0xff]  }
  0x10   : > { %5568 = vmatpush3.bf16.msra.mxu0 %v6584_v2  ;;  %6293 = vmatpush3.bf16.msra.mxu1 %v6584_v2  ;;  %v6645_v63 = vld [vmem:[%s7832_s2 + $0x150] sm:$0xff]   ;;  %v6647_v1 = vld [vmem:[%s7832_s2 + $0x158] sm:$0xff]   ;;  %v6648_v2 = vld [vmem:[%s7832_s2 + $0x120] sm:$0xff]  }
  0x11   : > { %s6803_s25 = scalar_lea.vmem %s7830_s0, %s6555_s22  ;;  %5569 = vmatprep.subr.bf16.mxu0 %v6585_v3  ;;  %6286 = vmatprep.subr.bf16.mxu1 %v6585_v3  ;;  %s5201_s8 = sadd.s32 256, %s6555_s22 }
  0x12   : > { %v6809_v4 = vld [vmem:[%s6803_s25 + $0x10] sm:$0xff]   ;;  %v6832_v11 = vld [vmem:[%s6803_s25 + $0x18] sm:$0xff]   ;;  %v6841_v14 = vld [vmem:[%s6803_s25 + $0x20] sm:$0xff]   ;;  %s6915_s18 = scalar_lea.vmem %s7831_s1, %s5201_s8 }
  0x13   : > { %v6812_v5 = vld [vmem:[%s6803_s25 + $0x90] sm:$0xff]   ;;  %5579 = vmatprep.mubr.bf16.mxu0 %v6809_v4  ;;  %v6838_v13 = vld [vmem:[%s6803_s25 + $0x98] sm:$0xff]   ;;  %v6844_v15 = vld [vmem:[%s6803_s25 + $0xa0] sm:$0xff]  }
  0x14   : > { %5611 = vmatprep.mubr.bf16.mxu1 %v6812_v5  ;;  %5570 = vmatpush3.bf16.msra.mxu0 %v6585_v3  ;;  %v6860_v19 = vld [vmem:[%s6803_s25 + $0x28] sm:$0xff]   ;;  %v6869_v22 = vld [vmem:[%s6803_s25 + $0x30] sm:$0xff]   ;;  %v6885_v26 = vld [vmem:[%s6803_s25 + $0x38] sm:$0xff]  }
  0x15   : > { %6294 = vmatpush3.bf16.msra.mxu1 %v6585_v3  ;;  %5571 = vmatprep.subr.bf16.mxu0 %v6586_v6  ;;  %v6866_v21 = vld [vmem:[%s6803_s25 + $0xa8] sm:$0xff]   ;;  %v6872_v23 = vld [vmem:[%s6803_s25 + $0xb0] sm:$0xff]   ;;  %v6888_v27 = vld [vmem:[%s6803_s25 + $0xb8] sm:$0xff]  }
  0x16   : > { %6287 = vmatprep.subr.bf16.mxu1 %v6586_v6  ;;  %v6897_v30 = vld [vmem:[%s6803_s25 + $0x40] sm:$0xff]   ;;  %v6920_v34 = vld [vmem:[%s6803_s25 + $0x48] sm:$0xff]   ;;  %v6932_v38 = vld [vmem:[%s6803_s25 + $0x50] sm:$0xff]  }
  0x17   : > { %v6900_v31 = vld [vmem:[%s6803_s25 + $0xc0] sm:$0xff]   ;;  %v6923_v35 = vld [vmem:[%s6803_s25 + $0xc8] sm:$0xff]   ;;  %v6935_v39 = vld [vmem:[%s6803_s25 + $0xd0] sm:$0xff]  }
  0x18   : > { %5572 = vmatpush3.bf16.msra.mxu0 %v6586_v6  ;;  %v6948_v42 = vld [vmem:[%s6803_s25 + $0x58] sm:$0xff]   ;;  %v6960_v46 = vld [vmem:[%s6803_s25 + $0x60] sm:$0xff]   ;;  %v6970_v48 = vld [vmem:[%s6803_s25 + $0x68] sm:$0xff]  }
  0x19   : > { %6295 = vmatpush3.bf16.msra.mxu1 %v6586_v6  ;;  %5573 = vmatprep.subr.bf16.mxu0 %v6587_v7  ;;  %v6951_v43 = vld [vmem:[%s6803_s25 + $0xd8] sm:$0xff]   ;;  %v6963_v47 = vld [vmem:[%s6803_s25 + $0xe0] sm:$0xff]   ;;  %v6973_v49 = vld [vmem:[%s6803_s25 + $0xe8] sm:$0xff]  }
  0x1a   : > { %6288 = vmatprep.subr.bf16.mxu1 %v6587_v7  ;;  %v6976_v50 = vld [vmem:[%s6803_s25 + $0x70] sm:$0xff]   ;;  %v6986_v52 = vld [vmem:[%s6803_s25 + $0x78] sm:$0xff]   ;;  %v6992_v54 = vld [vmem:[%s6803_s25 + $0x80] sm:$0xff]  }
  0x1b   : > { %v6979_v51 = vld [vmem:[%s6803_s25 + $0xf0] sm:$0xff]   ;;  %v6989_v53 = vld [vmem:[%s6803_s25 + $0xf8] sm:$0xff]   ;;  %v6995_v55 = vld [vmem:[%s6915_s18] sm:$0xff]  }
  0x1c   : > { %5574 = vmatpush3.bf16.msra.mxu0 %v6587_v7  ;;  %v7002_v56 = vld [vmem:[%s6803_s25 + $0x88] sm:$0xff]   ;;  %v7008_v58 = vld [vmem:[%s6803_s25] sm:$0xff]  }
  0x1d   : > { %6296 = vmatpush3.bf16.msra.mxu1 %v6587_v7  ;;  %5575 = vmatprep.subr.bf16.mxu0 %v6588_v8  ;;  %v7005_v57 = vld [vmem:[%s6915_s18 + $0x8] sm:$0xff]   ;;  %v6649_v3 = vld [vmem:[%s7832_s2 + $0x160] sm:$0xff]  }
  0x1e   : > { %6289 = vmatprep.subr.bf16.mxu1 %v6588_v8  ;;  %v7015_v59 = vld [vmem:[%s6803_s25 + $0x8] sm:$0xff]  }
  0x1f   : > { %v6650_v6 = vld [vmem:[%s7832_s2 + $0x128] sm:$0xff]  }
  0x20   : > { %5576 = vmatpush3.bf16.msra.mxu0 %v6588_v8  ;;  %v6651_v7 = vld [vmem:[%s7832_s2 + $0x168] sm:$0xff]  }
  0x21   : > { %6297 = vmatpush3.bf16.msra.mxu1 %v6588_v8  ;;  %5577 = vmatprep.subr.bf16.mxu0 %v6589_v9  ;;  %v6652_v8 = vld [vmem:[%s7832_s2 + $0x130] sm:$0xff]  }
  0x22   : > { %6290 = vmatprep.subr.bf16.mxu1 %v6589_v9 }
  0x24   : > { %5578 = vmatpush3.bf16.msra.mxu0 %v6589_v9 }
  0x25   : > { %6298 = vmatpush3.bf16.msra.mxu1 %v6589_v9  ;;  %5723 = vmatprep.subr.bf16.mxu0 %v6595_v12  ;;  %v6653_v9 = vld [vmem:[%s7832_s2 + $0x170] sm:$0xff]  }
  0x26   : > { %5643 = vmatprep.subr.bf16.mxu1 %v6594_v10 }
  0x27   : > { %5580 = vmatmul.mubr.bf16.vlgmr.msra.gmra.mrb[0].mxu0 %v6832_v11 }
  0x28   : > { %5612 = vmatmul.mubr.bf16.vlgmr.msra.gmra.mrb[0].mxu1 %v6838_v13  ;;  %5724 = vmatpush3.bf16.msra.mxu0 %v6595_v12  ;;  %v6655_v12 = vld [vmem:[%s7832_s2 + $0x178] sm:$0xff]  }
  0x29   : > { %5644 = vmatpush3.bf16.msra.mxu1 %v6594_v10  ;;  %5583 = vmatprep.mubr.bf16.mxu0 %v6841_v14  ;;  %v6654_v10 = vld [vmem:[%s7832_s2 + $0x138] sm:$0xff]  }
  0x2a   : > { %5615 = vmatprep.mubr.bf16.mxu1 %v6844_v15  ;;  %5645 = vmatprep.subr.bf16.mxu1 %v6600_v16 }
  0x2b   : > { %5725 = vmatprep.subr.bf16.mxu0 %v6601_v17 }
  0x2c   : > { %5726 = vmatpush3.bf16.msra.mxu0 %v6601_v17  ;;  %v6659_v17 = vld [vmem:[%s7832_s2 + $0x80] sm:$0xff]  }
  0x2d   : > { %5646 = vmatpush3.bf16.msra.mxu1 %v6600_v16  ;;  %5727 = vmatprep.subr.bf16.mxu0 %v6607_v20  ;;  %v6658_v16 = vld [vmem:[%s7832_s2 + $0x40] sm:$0xff]  }
  0x2e   : > { %5647 = vmatprep.subr.bf16.mxu1 %v6606_v18 }
  0x2f   : > { %5584 = vmatmul.mubr.bf16.gmra.mrb[4].mxu0 %v6860_v19 }
  0x30   : > { %5616 = vmatmul.mubr.bf16.gmra.mrb[4].mxu1 %v6866_v21  ;;  %5587 = vmatprep.mubr.bf16.mxu0 %v6869_v22 }
  0x31   : > { %5619 = vmatprep.mubr.bf16.mxu1 %v6872_v23  ;;  %5648 = vmatpush3.bf16.msra.mxu1 %v6606_v18  ;;  %v6660_v18 = vld [vmem:[%s7832_s2 + $0x48] sm:$0xff]  }
  0x32   : > { %5728 = vmatpush3.bf16.msra.mxu0 %v6607_v20  ;;  %5649 = vmatprep.subr.bf16.mxu1 %v6612_v24  ;;  %v6661_v20 = vld [vmem:[%s7832_s2 + $0x88] sm:$0xff]  }
  0x33   : > { %5729 = vmatprep.subr.bf16.mxu0 %v6613_v25 }
  0x35   : > { %5650 = vmatpush3.bf16.msra.mxu1 %v6612_v24  ;;  %v6663_v24 = vld [vmem:[%s7832_s2 + $0x90] sm:$0xff]  }
  0x36   : > { %5730 = vmatpush3.bf16.msra.mxu0 %v6613_v25  ;;  %5651 = vmatprep.subr.bf16.mxu1 %v6618_v28  ;;  %v6666_v25 = vld [vmem:[%s7832_s2 + $0x60] sm:$0xff]  }
  0x37   : > { %5731 = vmatprep.subr.bf16.mxu0 %v6619_v29  ;;  %5588 = vmatmul.mubr.bf16.gmra.mrb[8].mxu0 %v6885_v26 }
  0x38   : > { %5620 = vmatmul.mubr.bf16.gmra.mrb[8].mxu1 %v6888_v27  ;;  %5591 = vmatprep.mubr.bf16.mxu0 %v6897_v30 }
  0x39   : > { %5623 = vmatprep.mubr.bf16.mxu1 %v6900_v31  ;;  %5652 = vmatpush3.bf16.msra.mxu1 %v6618_v28  ;;  %v6667_v28 = vld [vmem:[%s7832_s2 + $0xa0] sm:$0xff]  }
  0x3a   : > { %5732 = vmatpush3.bf16.msra.mxu0 %v6619_v29  ;;  %5653 = vmatprep.subr.bf16.mxu1 %v6624_v32 }
  0x3b   : > { %5733 = vmatprep.subr.bf16.mxu0 %v6625_v33 }
  0x3d   : > { %5654 = vmatpush3.bf16.msra.mxu1 %v6624_v32 }
  0x3e   : > { %5734 = vmatpush3.bf16.msra.mxu0 %v6625_v33  ;;  %5655 = vmatprep.subr.bf16.mxu1 %v6630_v36  ;;  %v6670_v33 = vld [vmem:[%s7832_s2 + $0x70] sm:$0xff]  }
  0x3f   : > { %5735 = vmatprep.subr.bf16.mxu0 %v6631_v37  ;;  %5592 = vmatmul.mubr.bf16.gmra.mrb[12].mxu0 %v6920_v34 }
  0x40   : > { %5624 = vmatmul.mubr.bf16.gmra.mrb[12].mxu1 %v6923_v35  ;;  %5595 = vmatprep.mubr.bf16.mxu0 %v6932_v38 }
  0x41   : > { %5627 = vmatprep.mubr.bf16.mxu1 %v6935_v39  ;;  %5656 = vmatpush3.bf16.msra.mxu1 %v6630_v36  ;;  %v6671_v36 = vld [vmem:[%s7832_s2 + $0xb0] sm:$0xff]  }
  0x42   : > { %5736 = vmatpush3.bf16.msra.mxu0 %v6631_v37  ;;  %5657 = vmatprep.subr.bf16.mxu1 %v6636_v40 }
  0x43   : > { %5737 = vmatprep.subr.bf16.mxu0 %v6637_v41 }
  0x45   : > { %5658 = vmatpush3.bf16.msra.mxu1 %v6636_v40 }
  0x46   : > { %5738 = vmatpush3.bf16.msra.mxu0 %v6637_v41  ;;  %5803 = vmatprep.subr.bf16.mxu1 %v6640_v44 }
  0x47   : > { %6043 = vmatprep.subr.bf16.mxu0 %v6641_v45  ;;  %5596 = vmatmul.mubr.bf16.gmra.mrb[16].mxu0 %v6948_v42 }
  0x48   : > { %5628 = vmatmul.mubr.bf16.gmra.mrb[16].mxu1 %v6951_v43  ;;  %5599 = vmatprep.mubr.bf16.mxu0 %v6960_v46 }
  0x49   : > { %5631 = vmatprep.mubr.bf16.mxu1 %v6963_v47 }
  0x4f   : > { %5600 = vmatmul.mubr.bf16.gmra.mrb[20].mxu0 %v6970_v48 }
  0x50   : > { %5632 = vmatmul.mubr.bf16.gmra.mrb[20].mxu1 %v6973_v49  ;;  %5603 = vmatprep.mubr.bf16.mxu0 %v6976_v50 }
  0x51   : > { %5635 = vmatprep.mubr.bf16.mxu1 %v6979_v51 }
  0x57   : > { %5604 = vmatmul.mubr.bf16.gmra.mrb[24].mxu0 %v6986_v52 }
  0x58   : > { %5636 = vmatmul.mubr.bf16.gmra.mrb[24].mxu1 %v6989_v53  ;;  %5607 = vmatprep.mubr.bf16.mxu0 %v6992_v54 }
  0x59   : > { %5639 = vmatprep.mubr.bf16.mxu1 %v6995_v55 }
  0x5f   : > { %5608 = vmatmul.mubr.bf16.gmra.mrb[28].mxu0 %v7002_v56 }
  0x60   : > { %5640 = vmatmul.mubr.bf16.gmra.mrb[28].mxu1 %v7005_v57  ;;  %5739 = vmatprep.mubr.bf16.mxu0 %v6841_v14 }
  0x61   : > { %5659 = vmatprep.mubr.bf16.mxu1 %v7008_v58 }
  0x67   : > { %5740 = vmatmul.mubr.bf16.vlgmr.msra.gmra.mrb[32].mxu0 %v6860_v19 }
  0x68   : > { %5660 = vmatmul.mubr.bf16.vlgmr.msra.gmra.mrb[32].mxu1 %v7015_v59  ;;  %6044 = vmatpush3.bf16.msra.mxu0 %v6641_v45  ;;  %v6672_v45 = vld [vmem:[%s7832_s2 + $0x78] sm:$0xff]  }
  0x69   : > { %5804 = vmatpush3.bf16.msra.mxu1 %v6640_v44  ;;  %5663 = vmatprep.mubr.bf16.mxu1 %v6809_v4 }
  0x6a   : > { %5743 = vmatprep.mubr.bf16.mxu0 %v6869_v22  ;;  %5805 = vmatprep.subr.bf16.mxu1 %v6642_v60 }
  0x6b   : > { %6045 = vmatprep.subr.bf16.mxu0 %v6643_v61 }
  0x6c   : > { %6046 = vmatpush3.bf16.msra.mxu0 %v6643_v61 }
  0x6d   : > { %5806 = vmatpush3.bf16.msra.mxu1 %v6642_v60  ;;  %6047 = vmatprep.subr.bf16.mxu0 %v6645_v63  ;;  %v6673_v60 = vld [vmem:[%s7832_s2 + $0xb8] sm:$0xff]  }
  0x6e   : > { %5807 = vmatprep.subr.bf16.mxu1 %v6644_v62 }
  0x6f   : > { %5744 = vmatmul.mubr.bf16.gmra.mrb[36].mxu0 %v6885_v26 }
  0x70   : > { %5664 = vmatmul.mubr.bf16.gmra.mrb[36].mxu1 %v6832_v11  ;;  %5747 = vmatprep.mubr.bf16.mxu0 %v6897_v30 }
  0x71   : > { %5667 = vmatprep.mubr.bf16.mxu1 %v6841_v14  ;;  %5808 = vmatpush3.bf16.msra.mxu1 %v6644_v62 }
  0x72   : > { %6048 = vmatpush3.bf16.msra.mxu0 %v6645_v63  ;;  %5809 = vmatprep.subr.bf16.mxu1 %v6646_v0  ;;  %v7198_v63 = vld [vmem:[%s7832_s2 + $0x1c0] sm:$0xff]  }
  0x73   : > { %6049 = vmatprep.subr.bf16.mxu0 %v6647_v1 }
  0x75   : > { %5810 = vmatpush3.bf16.msra.mxu1 %v6646_v0  ;;  %v7203_v0 = vld [vmem:[%s7832_s2 + $0x200] sm:$0xff]  }
  0x76   : > { %6050 = vmatpush3.bf16.msra.mxu0 %v6647_v1  ;;  %5811 = vmatprep.subr.bf16.mxu1 %v6648_v2 }
  0x77   : > { %6051 = vmatprep.subr.bf16.mxu0 %v6649_v3  ;;  %5748 = vmatmul.mubr.bf16.gmra.mrb[40].mxu0 %v6920_v34 }
  0x78   : > { %5668 = vmatmul.mubr.bf16.gmra.mrb[40].mxu1 %v6860_v19  ;;  %5751 = vmatprep.mubr.bf16.mxu0 %v6932_v38 }
  0x79   : > { %5671 = vmatprep.mubr.bf16.mxu1 %v6869_v22  ;;  %5812 = vmatpush3.bf16.msra.mxu1 %v6648_v2 }
  0x7a   : > { %6052 = vmatpush3.bf16.msra.mxu0 %v6649_v3  ;;  %5813 = vmatprep.subr.bf16.mxu1 %v6650_v6 }
  0x7b   : > { %6053 = vmatprep.subr.bf16.mxu0 %v6651_v7 }
  0x7d   : > { %5814 = vmatpush3.bf16.msra.mxu1 %v6650_v6 }
  0x7e   : > { %6054 = vmatpush3.bf16.msra.mxu0 %v6651_v7  ;;  %5815 = vmatprep.subr.bf16.mxu1 %v6652_v8 }
  0x7f   : > { %6055 = vmatprep.subr.bf16.mxu0 %v6653_v9  ;;  %5752 = vmatmul.mubr.bf16.gmra.mrb[44].mxu0 %v6948_v42 }
  0x80   : > { %5672 = vmatmul.mubr.bf16.gmra.mrb[44].mxu1 %v6885_v26  ;;  %5755 = vmatprep.mubr.bf16.mxu0 %v6960_v46 }
  0x81   : > { %5675 = vmatprep.mubr.bf16.mxu1 %v6897_v30  ;;  %5816 = vmatpush3.bf16.msra.mxu1 %v6652_v8 }
  0x82   : > { %6056 = vmatpush3.bf16.msra.mxu0 %v6653_v9  ;;  %5817 = vmatprep.subr.bf16.mxu1 %v6654_v10 }
  0x83   : > { %6057 = vmatprep.subr.bf16.mxu0 %v6655_v12 }
  0x85   : > { %5818 = vmatpush3.bf16.msra.mxu1 %v6654_v10 }
  0x86   : > { %6058 = vmatpush3.bf16.msra.mxu0 %v6655_v12  ;;  %5883 = vmatprep.subr.bf16.mxu1 %v6658_v16 }
  0x87   : > { %6123 = vmatprep.subr.bf16.mxu0 %v6659_v17  ;;  %5756 = vmatmul.mubr.bf16.gmra.mrb[48].mxu0 %v6970_v48 }
  0x88   : > { %5676 = vmatmul.mubr.bf16.gmra.mrb[48].mxu1 %v6920_v34  ;;  %5759 = vmatprep.mubr.bf16.mxu0 %v6976_v50 }
  0x89   : > { %5679 = vmatprep.mubr.bf16.mxu1 %v6932_v38 }
  0x8f   : > { %5760 = vmatmul.mubr.bf16.gmra.mrb[52].mxu0 %v6986_v52 }
  0x90   : > { %5680 = vmatmul.mubr.bf16.gmra.mrb[52].mxu1 %v6948_v42  ;;  %5763 = vmatprep.mubr.bf16.mxu0 %v6992_v54 }
  0x91   : > { %5683 = vmatprep.mubr.bf16.mxu1 %v6960_v46 }
  0x97   : > { %5764 = vmatmul.mubr.bf16.gmra.mrb[56].mxu0 %v7002_v56 }
  0x98   : > { %5684 = vmatmul.mubr.bf16.gmra.mrb[56].mxu1 %v6970_v48  ;;  %5767 = vmatprep.mubr.bf16.mxu0 %v6812_v5 }
  0x99   : > { %5687 = vmatprep.mubr.bf16.mxu1 %v6976_v50 }
  0x9f   : > { %5768 = vmatmul.mubr.bf16.gmra.mrb[60].mxu0 %v6838_v13 }
  0xa0   : > { %5688 = vmatmul.mubr.bf16.gmra.mrb[60].mxu1 %v6986_v52  ;;  %5771 = vmatprep.mubr.bf16.mxu0 %v6844_v15 }
  0xa1   : > { %5691 = vmatprep.mubr.bf16.mxu1 %v6992_v54 }
  0xa7   : > { %5772 = vmatmul.mubr.bf16.gmra.mrb[64].mxu0 %v6866_v21 }
  0xa8   : > { %5692 = vmatmul.mubr.bf16.gmra.mrb[64].mxu1 %v7002_v56  ;;  %5775 = vmatprep.mubr.bf16.mxu0 %v6872_v23 }
  0xa9   : > { %5695 = vmatprep.mubr.bf16.mxu1 %v6812_v5  ;;  %v6656_v5 = vld [vmem:[%s6915_s18 + $0x10] sm:$0xff]  }
  0xaf   : > { %5776 = vmatmul.mubr.bf16.gmra.mrb[68].mxu0 %v6888_v27 }
  0xb0   : > { %5696 = vmatmul.mubr.bf16.gmra.mrb[68].mxu1 %v6838_v13  ;;  %5779 = vmatprep.mubr.bf16.mxu0 %v6900_v31  ;;  %v6657_v13 = vld [vmem:[%s6915_s18 + $0x18] sm:$0xff]  }
  0xb1   : > { %5699 = vmatprep.mubr.bf16.mxu1 %v6844_v15 }
  0xb7   : > { %5780 = vmatmul.mubr.bf16.gmra.mrb[72].mxu0 %v6923_v35 }
  0xb8   : > { %5700 = vmatmul.mubr.bf16.gmra.mrb[72].mxu1 %v6866_v21  ;;  %5783 = vmatprep.mubr.bf16.mxu0 %v6935_v39 }
  0xb9   : > { %5703 = vmatprep.mubr.bf16.mxu1 %v6872_v23 }
  0xbf   : > { %5784 = vmatmul.mubr.bf16.gmra.mrb[76].mxu0 %v6951_v43 }
  0xc0   : > { %5704 = vmatmul.mubr.bf16.gmra.mrb[76].mxu1 %v6888_v27  ;;  %5787 = vmatprep.mubr.bf16.mxu0 %v6963_v47 }
  0xc1   : > { %5707 = vmatprep.mubr.bf16.mxu1 %v6900_v31 }
  0xc7   : > { %5788 = vmatmul.mubr.bf16.gmra.mrb[80].mxu0 %v6973_v49 }
  0xc8   : > { %5708 = vmatmul.mubr.bf16.gmra.mrb[80].mxu1 %v6923_v35  ;;  %5791 = vmatprep.mubr.bf16.mxu0 %v6979_v51 }
  0xc9   : > { %5711 = vmatprep.mubr.bf16.mxu1 %v6935_v39 }
  0xcf   : > { %5792 = vmatmul.mubr.bf16.gmra.mrb[84].mxu0 %v6989_v53 }
  0xd0   : > { %5712 = vmatmul.mubr.bf16.gmra.mrb[84].mxu1 %v6951_v43  ;;  %5795 = vmatprep.mubr.bf16.mxu0 %v6995_v55 }
  0xd1   : > { %5715 = vmatprep.mubr.bf16.mxu1 %v6963_v47 }
  0xd7   : > { %5796 = vmatmul.mubr.bf16.gmra.mrb[88].mxu0 %v7005_v57 }
  0xd8   : > { %5716 = vmatmul.mubr.bf16.gmra.mrb[88].mxu1 %v6973_v49  ;;  %5799 = vmatprep.mubr.bf16.mxu0 %v6656_v5 }
  0xd9   : > { %5719 = vmatprep.mubr.bf16.mxu1 %v6979_v51 }
  0xdf   : > { %5800 = vmatmul.mubr.bf16.gmra.mrb[92].mxu0 %v6657_v13 }
  0xe0   : > { %5720 = vmatmul.mubr.bf16.gmra.mrb[92].mxu1 %v6989_v53  ;;  %6059 = vmatprep.mubr.bf16.mxu0 %v6809_v4 }
  0xe1   : > { %5819 = vmatprep.mubr.bf16.mxu1 %v6809_v4  ;;  %v6662_v4 = vld [vmem:[%s7832_s2 + $0x50] sm:$0xff]  }
  0xe7   : > { %6060 = vmatmul.mubr.bf16.vlgmr.msra.gmra.mrb[96].mxu0 %v6832_v11 }
  0xe8   : > { %5820 = vmatmul.mubr.bf16.vlgmr.msra.gmra.mrb[96].mxu1 %v6832_v11  ;;  %6124 = vmatpush3.bf16.msra.mxu0 %v6659_v17  ;;  %v6664_v11 = vld [vmem:[%s7832_s2 + $0x58] sm:$0xff]  }
  0xe9   : > { %5884 = vmatpush3.bf16.msra.mxu1 %v6658_v16  ;;  %5823 = vmatprep.mubr.bf16.mxu1 %v6841_v14 }
  0xea   : > { %6063 = vmatprep.mubr.bf16.mxu0 %v6841_v14  ;;  %5885 = vmatprep.subr.bf16.mxu1 %v6660_v18  ;;  %v6665_v14 = vld [vmem:[%s7832_s2 + $0x98] sm:$0xff]  }
  0xeb   : > { %6125 = vmatprep.subr.bf16.mxu0 %v6661_v20 }
  0xec   : > { %6126 = vmatpush3.bf16.msra.mxu0 %v6661_v20 }
  0xed   : > { %5886 = vmatpush3.bf16.msra.mxu1 %v6660_v18  ;;  %6127 = vmatprep.subr.bf16.mxu0 %v6663_v24 }
  0xee   : > { %5887 = vmatprep.subr.bf16.mxu1 %v6662_v4 }
  0xef   : > { %6064 = vmatmul.mubr.bf16.gmra.mrb[100].mxu0 %v6860_v19 }
  0xf0   : > { %5824 = vmatmul.mubr.bf16.gmra.mrb[100].mxu1 %v6860_v19  ;;  %6067 = vmatprep.mubr.bf16.mxu0 %v6869_v22  ;;  %v6668_v19 = vld [vmem:[%s7832_s2 + $0x68] sm:$0xff]  }
  0xf1   : > { %5827 = vmatprep.mubr.bf16.mxu1 %v6869_v22  ;;  %5888 = vmatpush3.bf16.msra.mxu1 %v6662_v4  ;;  %v6669_v22 = vld [vmem:[%s7832_s2 + $0xa8] sm:$0xff]  }
  0xf2   : > { %6128 = vmatpush3.bf16.msra.mxu0 %v6663_v24  ;;  %5889 = vmatprep.subr.bf16.mxu1 %v6664_v11 }
  0xf3   : > { %6129 = vmatprep.subr.bf16.mxu0 %v6665_v14 }
  0xf5   : > { %5890 = vmatpush3.bf16.msra.mxu1 %v6664_v11 }
  0xf6   : > { %6130 = vmatpush3.bf16.msra.mxu0 %v6665_v14  ;;  %5891 = vmatprep.subr.bf16.mxu1 %v6666_v25 }
  0xf7   : > { %6131 = vmatprep.subr.bf16.mxu0 %v6667_v28  ;;  %6068 = vmatmul.mubr.bf16.gmra.mrb[104].mxu0 %v6885_v26 }
  0xf8   : > { %5828 = vmatmul.mubr.bf16.gmra.mrb[104].mxu1 %v6885_v26  ;;  %6071 = vmatprep.mubr.bf16.mxu0 %v6897_v30 }
  0xf9   : > { %5831 = vmatprep.mubr.bf16.mxu1 %v6897_v30  ;;  %5892 = vmatpush3.bf16.msra.mxu1 %v6666_v25 }
  0xfa   : > { %6132 = vmatpush3.bf16.msra.mxu0 %v6667_v28  ;;  %v5581_v29 = vpop.f32.mrb[0].mxu0  ;;  %5893 = vmatprep.subr.bf16.mxu1 %v6668_v19 }
  0xfb   : > { %v5613_v32 = vpop.f32.mrb[0].mxu1  ;;  %6133 = vmatprep.subr.bf16.mxu0 %v6669_v22  ;;  %v7177_v37 = vpop.f32.mrb[1].mxu0 }
  0xfc   : > { %v7179_v26 = vpop.f32.mrb[1].mxu1  ;;  %v5582_v40 = vpop.f32.mrb[2].mxu0 }
  0xfd   : > { %v5614_v30 = vpop.f32.mrb[2].mxu1  ;;  %v7181_v41 = vpop.f32.mrb[3].mxu0  ;;  %5894 = vmatpush3.bf16.msra.mxu1 %v6668_v19 }
  0xfe   : > { %v7183_v44 = vpop.f32.mrb[3].mxu1  ;;  %6134 = vmatpush3.bf16.msra.mxu0 %v6669_v22  ;;  %5895 = vmatprep.subr.bf16.mxu1 %v6670_v33 }
  0xff   : > { %6135 = vmatprep.subr.bf16.mxu0 %v6671_v36  ;;  %6072 = vmatmul.mubr.bf16.gmra.mrb[108].mxu0 %v6920_v34 }
 0x100   : > { %5832 = vmatmul.mubr.bf16.gmra.mrb[108].mxu1 %v6920_v34  ;;  %6075 = vmatprep.mubr.bf16.mxu0 %v6932_v38 }
 0x101   : > { %5835 = vmatprep.mubr.bf16.mxu1 %v6932_v38  ;;  %5896 = vmatpush3.bf16.msra.mxu1 %v6670_v33 }
 0x102   : > { %6136 = vmatpush3.bf16.msra.mxu0 %v6671_v36  ;;  %v5585_v61 = vpop.f32.mrb[4].mxu0  ;;  %5897 = vmatprep.subr.bf16.mxu1 %v6672_v45 }
 0x103   : > { %v5617_v62 = vpop.f32.mrb[4].mxu1  ;;  %6137 = vmatprep.subr.bf16.mxu0 %v6673_v60  ;;  %v7205_v34 = vpop.f32.mrb[5].mxu0  ;;  %v7273_v61 = vld [vmem:[%s6803_s25 + $0xa0] sm:$0xff]  }
 0x104   : > { %v7207_v1 = vpop.f32.mrb[5].mxu1  ;;  %v5586_v38 = vpop.f32.mrb[6].mxu0 }
 0x105   : > { %v5618_v2 = vpop.f32.mrb[6].mxu1  ;;  %v7209_v3 = vpop.f32.mrb[7].mxu0  ;;  %5898 = vmatpush3.bf16.msra.mxu1 %v6672_v45 }
 0x106   : > { %v7211_v6 = vpop.f32.mrb[7].mxu1  ;;  %6138 = vmatpush3.bf16.msra.mxu0 %v6673_v60  ;;  %5963 = vmatprep.subr.bf16.mxu1 %v7198_v63 }
 0x107   : > { %6203 = vmatprep.subr.bf16.mxu0 %v7203_v0  ;;  %6076 = vmatmul.mubr.bf16.gmra.mrb[112].mxu0 %v6948_v42 }
 0x108   : > { %5836 = vmatmul.mubr.bf16.gmra.mrb[112].mxu1 %v6948_v42  ;;  %6079 = vmatprep.mubr.bf16.mxu0 %v6960_v46 }
 0x109   : > { %5839 = vmatprep.mubr.bf16.mxu1 %v6960_v46 }
 0x10a   : > { %v5589_v7 = vpop.f32.mrb[8].mxu0 }
 0x10b   : > { %v5621_v8 = vpop.f32.mrb[8].mxu1  ;;  %v7219_v9 = vpop.f32.mrb[9].mxu0 }
 0x10c   : > { %v7221_v10 = vpop.f32.mrb[9].mxu1  ;;  %v5590_v12 = vpop.f32.mrb[10].mxu0 }
 0x10d   : > { %v5622_v16 = vpop.f32.mrb[10].mxu1  ;;  %v7223_v17 = vpop.f32.mrb[11].mxu0 }
 0x10e   : > { %v7225_v5 = vpop.f32.mrb[11].mxu1 }
 0x10f   : > { %6080 = vmatmul.mubr.bf16.gmra.mrb[116].mxu0 %v6970_v48 }
 0x110   : > { %5840 = vmatmul.mubr.bf16.gmra.mrb[116].mxu1 %v6970_v48  ;;  %6083 = vmatprep.mubr.bf16.mxu0 %v6976_v50 }
 0x111   : > { %5843 = vmatprep.mubr.bf16.mxu1 %v6976_v50 }
 0x112   : > { %v5593_v42 = vpop.f32.mrb[12].mxu0 }
 0x113   : > { %v5625_v46 = vpop.f32.mrb[12].mxu1  ;;  %v7231_v13 = vpop.f32.mrb[13].mxu0 }
 0x114   : > { %v7233_v18 = vpop.f32.mrb[13].mxu1  ;;  %v5594_v20 = vpop.f32.mrb[14].mxu0 }
 0x115   : > { %v5626_v4 = vpop.f32.mrb[14].mxu1  ;;  %v7235_v24 = vpop.f32.mrb[15].mxu0 }
 0x116   : > { %v7237_v11 = vpop.f32.mrb[15].mxu1 }
 0x117   : > { %6084 = vmatmul.mubr.bf16.gmra.mrb[120].mxu0 %v6986_v52 }
 0x118   : > { %5844 = vmatmul.mubr.bf16.gmra.mrb[120].mxu1 %v6986_v52  ;;  %6087 = vmatprep.mubr.bf16.mxu0 %v6992_v54  ;;  %v7254_v52 = vld [vmem:[%s6803_s25 + $0x90] sm:$0xff]  }
 0x119   : > { %5847 = vmatprep.mubr.bf16.mxu1 %v6992_v54 }
 0x11a   : > { %v5597_v48 = vpop.f32.mrb[16].mxu0 }
 0x11b   : > { %v5629_v50 = vpop.f32.mrb[16].mxu1  ;;  %v7243_v14 = vpop.f32.mrb[17].mxu0 }
 0x11c   : > { %v7245_v25 = vpop.f32.mrb[17].mxu1  ;;  %v5598_v28 = vpop.f32.mrb[18].mxu0 }
 0x11d   : > { %v5630_v19 = vpop.f32.mrb[18].mxu1  ;;  %v7247_v22 = vpop.f32.mrb[19].mxu0 }
 0x11e   : > { %v7249_v29 = vpop.f32.mrb[19].mxu1 }
 0x11f   : > { %6088 = vmatmul.mubr.bf16.gmra.mrb[124].mxu0 %v7002_v56 }
 0x120   : > { %5848 = vmatmul.mubr.bf16.gmra.mrb[124].mxu1 %v7002_v56  ;;  %6091 = vmatprep.mubr.bf16.mxu0 %v7254_v52  ;;  %v7267_v56 = vld [vmem:[%s6803_s25 + $0x98] sm:$0xff]  }
 0x121   : > { %5851 = vmatprep.mubr.bf16.mxu1 %v7254_v52 }
 0x122   : > { %v5601_v54 = vpop.f32.mrb[20].mxu0 }
 0x123   : > { %v5633_v32 = vpop.f32.mrb[20].mxu1  ;;  %v7258_v33 = vpop.f32.mrb[21].mxu0 }
 0x124   : > { %v7260_v36 = vpop.f32.mrb[21].mxu1  ;;  %v5602_v40 = vpop.f32.mrb[22].mxu0 }
 0x125   : > { %v5634_v30 = vpop.f32.mrb[22].mxu1  ;;  %v7262_v45 = vpop.f32.mrb[23].mxu0 }
 0x126   : > { %v7264_v60 = vpop.f32.mrb[23].mxu1 }
 0x127   : > { %6092 = vmatmul.mubr.bf16.gmra.mrb[128].mxu0 %v7267_v56 }
 0x128   : > { %5852 = vmatmul.mubr.bf16.gmra.mrb[128].mxu1 %v7267_v56  ;;  %6095 = vmatprep.mubr.bf16.mxu0 %v7273_v61 }
 0x129   : > { %5855 = vmatprep.mubr.bf16.mxu1 %v6844_v15 }
 0x12a   : > { %v5605_v62 = vpop.f32.mrb[24].mxu0 }
 0x12b   : > { %v5637_v38 = vpop.f32.mrb[24].mxu1  ;;  %v7276_v2 = vpop.f32.mrb[25].mxu0 }
 0x12c   : > { %v7278_v7 = vpop.f32.mrb[25].mxu1  ;;  %v5606_v8 = vpop.f32.mrb[26].mxu0 }
 0x12d   : > { %v5638_v12 = vpop.f32.mrb[26].mxu1  ;;  %v7280_v16 = vpop.f32.mrb[27].mxu0 }
 0x12e   : > { %v7282_v42 = vpop.f32.mrb[27].mxu1 }
 0x12f   : > { %6096 = vmatmul.mubr.bf16.gmra.mrb[132].mxu0 %v6866_v21 }
 0x130   : > { %5856 = vmatmul.mubr.bf16.gmra.mrb[132].mxu1 %v6866_v21  ;;  %6099 = vmatprep.mubr.bf16.mxu0 %v6872_v23 }
 0x131   : > { %5859 = vmatprep.mubr.bf16.mxu1 %v6872_v23 }
 0x132   : > { %v5609_v15 = vpop.f32.mrb[28].mxu0 }
 0x133   : > { %v5641_v46 = vpop.f32.mrb[28].mxu1  ;;  %v7288_v20 = vpop.f32.mrb[29].mxu0 }
 0x134   : > { %v7290_v4 = vpop.f32.mrb[29].mxu1  ;;  %v5610_v48 = vpop.f32.mrb[30].mxu0 }
 0x135   : > { %v5642_v50 = vpop.f32.mrb[30].mxu1  ;;  %v7292_v28 = vpop.f32.mrb[31].mxu0 }
 0x136   : > { %v7294_v19 = vpop.f32.mrb[31].mxu1 }
 0x137   : > { %6100 = vmatmul.mubr.bf16.gmra.mrb[136].mxu0 %v6888_v27 }
 0x138   : > { %5860 = vmatmul.mubr.bf16.gmra.mrb[136].mxu1 %v6888_v27  ;;  %6103 = vmatprep.mubr.bf16.mxu0 %v6900_v31 }
 0x139   : > { %5863 = vmatprep.mubr.bf16.mxu1 %v6900_v31 }
 0x13a   : > { %v5741_v23 = vpop.f32.mrb[32].mxu0 }
 0x13b   : > { %v5661_v21 = vpop.f32.mrb[32].mxu1  ;;  %v1461_v32 = vpop.f32.mrb[33].mxu0 }
 0x13c   : > { %v1107_v54 = vpop.f32.mrb[33].mxu1  ;;  %v5742_v62 = vpop.f32.mrb[34].mxu0 }
 0x13d   : > { %v1108_v40 = vadd.f32 %v1107_v54, %v7177_v37  ;;  %v5662_v30 = vpop.f32.mrb[34].mxu1  ;;  %v1464_v8 = vpop.f32.mrb[35].mxu0 }
 0x13e   : > { %v1110_v38 = vpop.f32.mrb[35].mxu1 }
 0x13f   : > { %v7301_v12 = vadd.f32 %v1461_v32, %v1108_v40  ;;  %v1111_v15 = vadd.f32 %v1110_v38, %v7181_v41  ;;  %6104 = vmatmul.mubr.bf16.gmra.mrb[140].mxu0 %v6923_v35 }
 0x140   : > { %5864 = vmatmul.mubr.bf16.gmra.mrb[140].mxu1 %v6923_v35  ;;  %6107 = vmatprep.mubr.bf16.mxu0 %v6935_v39 }
 0x141   : > { %v7306_v27 = vadd.f32 %v1464_v8, %v1111_v15  ;;  %5867 = vmatprep.mubr.bf16.mxu1 %v6935_v39 }
 0x142   : > { %v5745_v37 = vpop.f32.mrb[36].mxu0 }
 0x143   : > { %v5665_v31 = vpop.f32.mrb[36].mxu1  ;;  %v1477_v48 = vpop.f32.mrb[37].mxu0 }
 0x144   : > { %v1123_v46 = vpop.f32.mrb[37].mxu1  ;;  %v5746_v23 = vpop.f32.mrb[38].mxu0 }
 0x145   : > { %v1124_v50 = vadd.f32 %v1123_v46, %v7205_v34  ;;  %v5666_v21 = vpop.f32.mrb[38].mxu1  ;;  %v1480_v41 = vpop.f32.mrb[39].mxu0 }
 0x146   : > { %v1126_v54 = vpop.f32.mrb[39].mxu1 }
 0x147   : > { %v7311_v32 = vadd.f32 %v1477_v48, %v1124_v50  ;;  %v1127_v35 = vadd.f32 %v1126_v54, %v7209_v3  ;;  %6108 = vmatmul.mubr.bf16.gmra.mrb[144].mxu0 %v6951_v43 }
 0x148   : > { %5868 = vmatmul.mubr.bf16.gmra.mrb[144].mxu1 %v6951_v43  ;;  %6111 = vmatprep.mubr.bf16.mxu0 %v6963_v47 }
 0x149   : > { %v7316_v40 = vadd.f32 %v1480_v41, %v1127_v35  ;;  %5871 = vmatprep.mubr.bf16.mxu1 %v6963_v47 }
 0x14a   : > { %v5749_v34 = vpop.f32.mrb[40].mxu0 }
 0x14b   : > { %v5669_v39 = vpop.f32.mrb[40].mxu1  ;;  %v1493_v62 = vpop.f32.mrb[41].mxu0 }
 0x14c   : > { %v1139_v30 = vpop.f32.mrb[41].mxu1  ;;  %v5750_v15 = vpop.f32.mrb[42].mxu0 }
 0x14d   : > { %v1140_v38 = vadd.f32 %v1139_v30, %v7219_v9  ;;  %v5670_v8 = vpop.f32.mrb[42].mxu1  ;;  %v1496_v3 = vpop.f32.mrb[43].mxu0 }
 0x14e   : > { %v1142_v31 = vpop.f32.mrb[43].mxu1 }
 0x14f   : > { %v7321_v37 = vadd.f32 %v1493_v62, %v1140_v38  ;;  %v1143_v43 = vadd.f32 %v1142_v31, %v7223_v17  ;;  %6112 = vmatmul.mubr.bf16.gmra.mrb[148].mxu0 %v6973_v49 }
 0x150   : > { %5872 = vmatmul.mubr.bf16.gmra.mrb[148].mxu1 %v6973_v49  ;;  %6115 = vmatprep.mubr.bf16.mxu0 %v6979_v51 }
 0x151   : > { %v7326_v46 = vadd.f32 %v1496_v3, %v1143_v43  ;;  %5875 = vmatprep.mubr.bf16.mxu1 %v6979_v51 }
 0x152   : > { %v5753_v9 = vpop.f32.mrb[44].mxu0 }
 0x153   : > { %v5673_v47 = vpop.f32.mrb[44].mxu1  ;;  %v1509_v50 = vpop.f32.mrb[45].mxu0 }
 0x154   : > { %v1155_v48 = vpop.f32.mrb[45].mxu1  ;;  %v5754_v54 = vpop.f32.mrb[46].mxu0 }
 0x155   : > { %v1156_v21 = vadd.f32 %v1155_v48, %v7231_v13  ;;  %v5674_v23 = vpop.f32.mrb[46].mxu1  ;;  %v1512_v17 = vpop.f32.mrb[47].mxu0  ;;  %v6676_v54 = vld [vmem:[%s7832_s2 + $0x1c8] sm:$0xff]  }
 0x156   : > { %v1158_v41 = vpop.f32.mrb[47].mxu1 }
 0x157   : > { %v7331_v35 = vadd.f32 %v1509_v50, %v1156_v21  ;;  %v1159_v49 = vadd.f32 %v1158_v41, %v7235_v24  ;;  %6116 = vmatmul.mubr.bf16.gmra.mrb[152].mxu0 %v6989_v53  ;;  %v6693_v41 = vld [vmem:[%s6803_s25 + $0x10] sm:$0xff]  }
 0x158   : > { %5876 = vmatmul.mubr.bf16.gmra.mrb[152].mxu1 %v6989_v53  ;;  %6119 = vmatprep.mubr.bf16.mxu0 %v6995_v55 }
 0x159   : > { %v7336_v39 = vadd.f32 %v1512_v17, %v1159_v49  ;;  %5879 = vmatprep.mubr.bf16.mxu1 %v6995_v55  ;;  %v6679_v17 = vld [vmem:[%s7832_s2 + $0x210] sm:$0xff]  }
 0x15a   : > { %v5757_v13 = vpop.f32.mrb[48].mxu0 }
 0x15b   : > { %v5677_v51 = vpop.f32.mrb[48].mxu1  ;;  %v1525_v30 = vpop.f32.mrb[49].mxu0 }
 0x15c   : > { %v1171_v34 = vpop.f32.mrb[49].mxu1  ;;  %v5758_v8 = vpop.f32.mrb[50].mxu0 }
 0x15d   : > { %v1172_v62 = vadd.f32 %v1171_v34, %v7243_v14  ;;  %v5678_v38 = vpop.f32.mrb[50].mxu1  ;;  %v1528_v24 = vpop.f32.mrb[51].mxu0 }
 0x15e   : > { %v1174_v15 = vpop.f32.mrb[51].mxu1 }
 0x15f   : > { %v7341_v31 = vadd.f32 %v1525_v30, %v1172_v62  ;;  %v1175_v53 = vadd.f32 %v1174_v15, %v7247_v22  ;;  %6120 = vmatmul.mubr.bf16.gmra.mrb[156].mxu0 %v7005_v57  ;;  %v6680_v15 = vld [vmem:[%s7832_s2 + $0x1d8] sm:$0xff]  }
 0x160   : > { %5880 = vmatmul.mubr.bf16.gmra.mrb[156].mxu1 %v7005_v57  ;;  %6139 = vmatprep.mubr.bf16.mxu0 %v7008_v58 }
 0x161   : > { %v7346_v3 = vadd.f32 %v1528_v24, %v1175_v53  ;;  %5899 = vmatprep.mubr.bf16.mxu1 %v7008_v58  ;;  %v6677_v58 = vld [vmem:[%s7832_s2 + $0x208] sm:$0xff]   ;;  %v6694_v24 = vld [vmem:[%s6803_s25 + $0x18] sm:$0xff]  }
 0x162   : > { %v5761_v14 = vpop.f32.mrb[52].mxu0 }
 0x163   : > { %v5681_v55 = vpop.f32.mrb[52].mxu1  ;;  %v1541_v47 = vpop.f32.mrb[53].mxu0 }
 0x164   : > { %v1187_v43 = vpop.f32.mrb[53].mxu1  ;;  %v5762_v50 = vpop.f32.mrb[54].mxu0  ;;  %v7387_v55 = vld [vmem:[%s6803_s25 + $0x20] sm:$0xff]  }
 0x165   : > { %v1188_v9 = vadd.f32 %v1187_v43, %v7258_v33  ;;  %v5682_v48 = vpop.f32.mrb[54].mxu1  ;;  %v1544_v21 = vpop.f32.mrb[55].mxu0  ;;  %v6682_v43 = vld [vmem:[%s7832_s2 + $0x1e0] sm:$0xff]  }
 0x166   : > { %v1190_v22 = vpop.f32.mrb[55].mxu1 }
 0x167   : > { %v7351_v23 = vadd.f32 %v1541_v47, %v1188_v9  ;;  %v1191_v57 = vadd.f32 %v1190_v22, %v7262_v45  ;;  %6140 = vmatmul.mubr.bf16.vlgmr.msra.gmra.mrb[96].mxu0 %v7015_v59  ;;  %v6678_v45 = vld [vmem:[%s7832_s2 + $0x1d0] sm:$0xff]   ;;  %v6683_v47 = vld [vmem:[%s7832_s2 + $0x220] sm:$0xff]  }
 0x168   : > { %5900 = vmatmul.mubr.bf16.vlgmr.msra.gmra.mrb[96].mxu1 %v7015_v59  ;;  %6204 = vmatpush3.bf16.msra.mxu0 %v7203_v0 }
 0x169   : > { %v7362_v33 = vadd.f32 %v1544_v21, %v1191_v57  ;;  %5964 = vmatpush3.bf16.msra.mxu1 %v7198_v63  ;;  %5903 = vmatprep.mubr.bf16.mxu1 %v6693_v41 }
 0x16a   : > { %6143 = vmatprep.mubr.bf16.mxu0 %v6693_v41  ;;  %v5765_v51 = vpop.f32.mrb[56].mxu0  ;;  %5965 = vmatprep.subr.bf16.mxu1 %v6676_v54 }
 0x16b   : > { %v5685_v49 = vpop.f32.mrb[56].mxu1  ;;  %6205 = vmatprep.subr.bf16.mxu0 %v6677_v58  ;;  %v1557_v63 = vpop.f32.mrb[57].mxu0  ;;  %v7415_v51 = vld [vmem:[%s6803_s25 + $0x30] sm:$0xff]  }
 0x16c   : > { %v1203_v59 = vpop.f32.mrb[57].mxu1  ;;  %v5766_v34 = vpop.f32.mrb[58].mxu0  ;;  %6206 = vmatpush3.bf16.msra.mxu0 %v6677_v58 }
 0x16d   : > { %v1204_v0 = vadd.f32 %v1203_v59, %v7276_v2  ;;  %v5686_v13 = vpop.f32.mrb[58].mxu1  ;;  %5966 = vmatpush3.bf16.msra.mxu1 %v6676_v54  ;;  %v1560_v62 = vpop.f32.mrb[59].mxu0  ;;  %6207 = vmatprep.subr.bf16.mxu0 %v6679_v17  ;;  %v6681_v2 = vld [vmem:[%s7832_s2 + $0x218] sm:$0xff]  }
 0x16e   : > { %v1206_v30 = vpop.f32.mrb[59].mxu1  ;;  %5967 = vmatprep.subr.bf16.mxu1 %v6678_v45 }
 0x16f   : > { %v7374_v38 = vadd.f32 %v1557_v63, %v1204_v0  ;;  %v1207_v8 = vadd.f32 %v1206_v30, %v7280_v16  ;;  %6144 = vmatmul.mubr.bf16.gmra.mrb[100].mxu0 %v6694_v24  ;;  %v6686_v63 = vld [vmem:[%s7832_s2 + $0x1f0] sm:$0xff]  }
 0x170   : > { %5904 = vmatmul.mubr.bf16.gmra.mrb[100].mxu1 %v6694_v24  ;;  %6147 = vmatprep.mubr.bf16.mxu0 %v7387_v55  ;;  %v6687_v0 = vld [vmem:[%s7832_s2 + $0x230] sm:$0xff]  }
 0x171   : > { %v7384_v53 = vadd.f32 %v1560_v62, %v1207_v8  ;;  %5907 = vmatprep.mubr.bf16.mxu1 %v7387_v55  ;;  %5968 = vmatpush3.bf16.msra.mxu1 %v6678_v45  ;;  %v6684_v45 = vld [vmem:[%s7832_s2 + $0x1e8] sm:$0xff]  }
 0x172   : > { %6208 = vmatpush3.bf16.msra.mxu0 %v6679_v17  ;;  %v5769_v14 = vpop.f32.mrb[60].mxu0  ;;  %5969 = vmatprep.subr.bf16.mxu1 %v6680_v15  ;;  %v7408_v17 = vld [vmem:[%s6803_s25 + $0x28] sm:$0xff]  }
 0x173   : > { %v5689_v16 = vpop.f32.mrb[60].mxu1  ;;  %6209 = vmatprep.subr.bf16.mxu0 %v6681_v2  ;;  %v1573_v48 = vpop.f32.mrb[61].mxu0  ;;  %v6688_v14 = vld [vmem:[%s7832_s2 + $0x1f8] sm:$0xff]  }
 0x174   : > { %v1219_v9 = vpop.f32.mrb[61].mxu1  ;;  %v5770_v21 = vpop.f32.mrb[62].mxu0 }
 0x175   : > { %v1220_v50 = vadd.f32 %v1219_v9, %v7288_v20  ;;  %v5690_v22 = vpop.f32.mrb[62].mxu1  ;;  %v1576_v54 = vpop.f32.mrb[63].mxu0  ;;  %5970 = vmatpush3.bf16.msra.mxu1 %v6680_v15  ;;  %v6685_v20 = vld [vmem:[%s7832_s2 + $0x228] sm:$0xff]   ;;  %v7443_v9 = vld [vmem:[%s6803_s25 + $0x40] sm:$0xff]  }
 0x176   : > { %v1222_v57 = vpop.f32.mrb[63].mxu1  ;;  %6210 = vmatpush3.bf16.msra.mxu0 %v6681_v2  ;;  %5971 = vmatprep.subr.bf16.mxu1 %v6682_v43 }
 0x177   : > { %v7398_v58 = vadd.f32 %v1573_v48, %v1220_v50  ;;  %v1223_v41 = vadd.f32 %v1222_v57, %v7292_v28  ;;  %6211 = vmatprep.subr.bf16.mxu0 %v6683_v47  ;;  %6148 = vmatmul.mubr.bf16.gmra.mrb[104].mxu0 %v7408_v17 }
 0x178   : > { %5908 = vmatmul.mubr.bf16.gmra.mrb[104].mxu1 %v7408_v17  ;;  %6151 = vmatprep.mubr.bf16.mxu0 %v7415_v51 }
 0x179   : > { %v7412_v49 = vadd.f32 %v1576_v54, %v1223_v41  ;;  %5911 = vmatprep.mubr.bf16.mxu1 %v7415_v51  ;;  %5972 = vmatpush3.bf16.msra.mxu1 %v6682_v43  ;;  %v7436_v43 = vld [vmem:[%s6803_s25 + $0x38] sm:$0xff]  }
 0x17a   : > { %6212 = vmatpush3.bf16.msra.mxu0 %v6683_v47  ;;  %v5773_v59 = vpop.f32.mrb[64].mxu0  ;;  %5973 = vmatprep.subr.bf16.mxu1 %v6684_v45 }
 0x17b   : > { %v5693_v28 = vpop.f32.mrb[64].mxu1  ;;  %6213 = vmatprep.subr.bf16.mxu0 %v6685_v20  ;;  %v1589_v34 = vpop.f32.mrb[65].mxu0  ;;  %v7452_v59 = vld [vmem:[%s6803_s25 + $0x48] sm:$0xff]  }
 0x17c   : > { %v1235_v13 = vpop.f32.mrb[65].mxu1  ;;  %v5774_v8 = vpop.f32.mrb[66].mxu0 }
 0x17d   : > { %v1236_v30 = vadd.f32 %v1235_v13, %v7179_v26  ;;  %v5694_v62 = vpop.f32.mrb[66].mxu1  ;;  %v1592_v2 = vpop.f32.mrb[67].mxu0  ;;  %5974 = vmatpush3.bf16.msra.mxu1 %v6684_v45  ;;  %v6689_v26 = vld [vmem:[%s7832_s2 + $0x238] sm:$0xff]  }
 0x17e   : > { %v1238_v15 = vpop.f32.mrb[67].mxu1  ;;  %6214 = vmatpush3.bf16.msra.mxu0 %v6685_v20  ;;  %5975 = vmatprep.subr.bf16.mxu1 %v6686_v63 }
 0x17f   : > { %v7426_v24 = vadd.f32 %v1589_v34, %v1236_v30  ;;  %v1239_v16 = vadd.f32 %v1238_v15, %v7183_v44  ;;  %6215 = vmatprep.subr.bf16.mxu0 %v6687_v0  ;;  %6152 = vmatmul.mubr.bf16.gmra.mrb[108].mxu0 %v7436_v43 }
 0x180   : > { %5912 = vmatmul.mubr.bf16.gmra.mrb[108].mxu1 %v7436_v43  ;;  %6155 = vmatprep.mubr.bf16.mxu0 %v7443_v9 }
 0x181   : > { %v7440_v47 = vadd.f32 %v1592_v2, %v1239_v16  ;;  %5915 = vmatprep.mubr.bf16.mxu1 %v7443_v9  ;;  %5976 = vmatpush3.bf16.msra.mxu1 %v6686_v63 }
 0x182   : > { %6216 = vmatpush3.bf16.msra.mxu0 %v6687_v0  ;;  %v5777_v48 = vpop.f32.mrb[68].mxu0  ;;  %5977 = vmatprep.subr.bf16.mxu1 %v6688_v14 }
 0x183   : > { %v5697_v44 = vpop.f32.mrb[68].mxu1  ;;  %6217 = vmatprep.subr.bf16.mxu0 %v6689_v26  ;;  %v1605_v22 = vpop.f32.mrb[69].mxu0  ;;  %v7475_v48 = vld [vmem:[%s6803_s25 + $0x60] sm:$0xff]  }
 0x184   : > { %v1251_v50 = vpop.f32.mrb[69].mxu1  ;;  %v5778_v54 = vpop.f32.mrb[70].mxu0 }
 0x185   : > { %v1252_v21 = vadd.f32 %v1251_v50, %v7207_v1  ;;  %v5698_v57 = vpop.f32.mrb[70].mxu1  ;;  %v1608_v45 = vpop.f32.mrb[71].mxu0  ;;  %5978 = vmatpush3.bf16.msra.mxu1 %v6688_v14  ;;  %v7459_v1 = vld [vmem:[%s6803_s25 + $0x50] sm:$0xff]  }
 0x186   : > { %v1254_v41 = vpop.f32.mrb[71].mxu1  ;;  %6218 = vmatpush3.bf16.msra.mxu0 %v6689_v26  ;;  %v7468_v26 = vld [vmem:[%s6803_s25 + $0x58] sm:$0xff]  }
 0x187   : > { %v7448_v20 = vadd.f32 %v1605_v22, %v1252_v21  ;;  %v1255_v28 = vadd.f32 %v1254_v41, %v7211_v6  ;;  %6156 = vmatmul.mubr.bf16.gmra.mrb[112].mxu0 %v7452_v59 }
 0x188   : > { %5916 = vmatmul.mubr.bf16.gmra.mrb[112].mxu1 %v7452_v59  ;;  %6159 = vmatprep.mubr.bf16.mxu0 %v7459_v1 }
 0x189   : > { %v7456_v63 = vadd.f32 %v1608_v45, %v1255_v28  ;;  %5919 = vmatprep.mubr.bf16.mxu1 %v7459_v1 }
 0x18a   : > { %v5781_v13 = vpop.f32.mrb[72].mxu0 }
 0x18b   : > { %v5701_v0 = vpop.f32.mrb[72].mxu1  ;;  %v1621_v6 = vpop.f32.mrb[73].mxu0  ;;  %v7484_v13 = vld [vmem:[%s6803_s25 + $0x68] sm:$0xff]  }
 0x18c   : > { %v1267_v34 = vpop.f32.mrb[73].mxu1  ;;  %v5782_v8 = vpop.f32.mrb[74].mxu0 }
 0x18d   : > { %v1268_v30 = vadd.f32 %v1267_v34, %v7221_v10  ;;  %v5702_v62 = vpop.f32.mrb[74].mxu1  ;;  %v1624_v2 = vpop.f32.mrb[75].mxu0 }
 0x18e   : > { %v1270_v15 = vpop.f32.mrb[75].mxu1 }
 0x18f   : > { %v7464_v16 = vadd.f32 %v1621_v6, %v1268_v30  ;;  %v1271_v14 = vadd.f32 %v1270_v15, %v7225_v5  ;;  %6160 = vmatmul.mubr.bf16.gmra.mrb[116].mxu0 %v7468_v26  ;;  %v7491_v6 = vld [vmem:[%s6803_s25 + $0x70] sm:$0xff]  }
 0x190   : > { %5920 = vmatmul.mubr.bf16.gmra.mrb[116].mxu1 %v7468_v26  ;;  %6163 = vmatprep.mubr.bf16.mxu0 %v7475_v48 }
 0x191   : > { %v7472_v44 = vadd.f32 %v1624_v2, %v1271_v14  ;;  %5923 = vmatprep.mubr.bf16.mxu1 %v7475_v48 }
 0x192   : > { %v5785_v50 = vpop.f32.mrb[76].mxu0 }
 0x193   : > { %v5705_v10 = vpop.f32.mrb[76].mxu1  ;;  %v1637_v5 = vpop.f32.mrb[77].mxu0 }
 0x194   : > { %v1283_v22 = vpop.f32.mrb[77].mxu1  ;;  %v5786_v54 = vpop.f32.mrb[78].mxu0 }
 0x195   : > { %v1284_v21 = vadd.f32 %v1283_v22, %v7233_v18  ;;  %v5706_v57 = vpop.f32.mrb[78].mxu1  ;;  %v1640_v45 = vpop.f32.mrb[79].mxu0 }
 0x196   : > { %v1286_v41 = vpop.f32.mrb[79].mxu1  ;;  %v7507_v57 = vld [vmem:[%s6803_s25 + $0x80] sm:$0xff]  }
 0x197   : > { %v7480_v28 = vadd.f32 %v1637_v5, %v1284_v21  ;;  %v1287_v0 = vadd.f32 %v1286_v41, %v7237_v11  ;;  %6164 = vmatmul.mubr.bf16.gmra.mrb[120].mxu0 %v7484_v13  ;;  %v7500_v5 = vld [vmem:[%s6803_s25 + $0x78] sm:$0xff]  }
 0x198   : > { %5924 = vmatmul.mubr.bf16.gmra.mrb[120].mxu1 %v7484_v13  ;;  %6167 = vmatprep.mubr.bf16.mxu0 %v7491_v6 }
 0x199   : > { %v7488_v34 = vadd.f32 %v1640_v45, %v1287_v0  ;;  %5927 = vmatprep.mubr.bf16.mxu1 %v7491_v6 }
 0x19a   : > { %v5789_v30 = vpop.f32.mrb[80].mxu0 }
 0x19b   : > { %v5709_v18 = vpop.f32.mrb[80].mxu1  ;;  %v1653_v11 = vpop.f32.mrb[81].mxu0 }
 0x19c   : > { %v1299_v62 = vpop.f32.mrb[81].mxu1  ;;  %v5790_v2 = vpop.f32.mrb[82].mxu0 }
 0x19d   : > { %v1300_v8 = vadd.f32 %v1299_v62, %v7245_v25  ;;  %v5710_v15 = vpop.f32.mrb[82].mxu1  ;;  %v1656_v10 = vpop.f32.mrb[83].mxu0 }
 0x19e   : > { %v1302_v14 = vpop.f32.mrb[83].mxu1  ;;  %v7516_v15 = vld [vmem:[%s6803_s25 + $0x88] sm:$0xff]  }
 0x19f   : > { %v7496_v50 = vadd.f32 %v1653_v11, %v1300_v8  ;;  %v1303_v22 = vadd.f32 %v1302_v14, %v7249_v29  ;;  %6168 = vmatmul.mubr.bf16.gmra.mrb[124].mxu0 %v7500_v5 }
 0x1a0   : > { %5928 = vmatmul.mubr.bf16.gmra.mrb[124].mxu1 %v7500_v5  ;;  %6171 = vmatprep.mubr.bf16.mxu0 %v7507_v57 }
 0x1a1   : > { %v7504_v21 = vadd.f32 %v1656_v10, %v1303_v22  ;;  %5931 = vmatprep.mubr.bf16.mxu1 %v7507_v57 }
 0x1a2   : > { %v5793_v54 = vpop.f32.mrb[84].mxu0 }
 0x1a3   : > { %v5713_v25 = vpop.f32.mrb[84].mxu1  ;;  %v1669_v45 = vpop.f32.mrb[85].mxu0 }
 0x1a4   : > { %v1315_v41 = vpop.f32.mrb[85].mxu1  ;;  %v5794_v18 = vpop.f32.mrb[86].mxu0 }
 0x1a5   : > { %v1316_v29 = vadd.f32 %v1315_v41, %v7260_v36  ;;  %v5714_v0 = vpop.f32.mrb[86].mxu1  ;;  %v1672_v62 = vpop.f32.mrb[87].mxu0 }
 0x1a6   : > { %v1318_v30 = vpop.f32.mrb[87].mxu1 }
 0x1a7   : > { %v7512_v11 = vadd.f32 %v1669_v45, %v1316_v29  ;;  %v1319_v8 = vadd.f32 %v1318_v30, %v7264_v60  ;;  %6172 = vmatmul.mubr.bf16.gmra.mrb[128].mxu0 %v7516_v15 }
 0x1a8   : > { %5932 = vmatmul.mubr.bf16.gmra.mrb[128].mxu1 %v7516_v15  ;;  %6175 = vmatprep.mubr.bf16.mxu0 %v7254_v52 }
 0x1a9   : > { %v7520_v2 = vadd.f32 %v1672_v62, %v1319_v8  ;;  %5935 = vmatprep.mubr.bf16.mxu1 %v7254_v52 }
 0x1aa   : > { %v5797_v14 = vpop.f32.mrb[88].mxu0 }
 0x1ab   : > { %v5717_v36 = vpop.f32.mrb[88].mxu1  ;;  %v1685_v22 = vpop.f32.mrb[89].mxu0 }
 0x1ac   : > { %v1331_v10 = vpop.f32.mrb[89].mxu1  ;;  %v5798_v60 = vpop.f32.mrb[90].mxu0 }
 0x1ad   : > { %v1332_v25 = vadd.f32 %v1331_v10, %v7278_v7  ;;  %v5718_v54 = vpop.f32.mrb[90].mxu1  ;;  %v1688_v45 = vpop.f32.mrb[91].mxu0  ;;  %v7539_v60 = vld [vmem:[%s6803_s25 + $0xa8] sm:$0xff]  }
 0x1ae   : > { %v1334_v41 = vpop.f32.mrb[91].mxu1 }
 0x1af   : > { %v7525_v29 = vadd.f32 %v1685_v22, %v1332_v25  ;;  %v1335_v0 = vadd.f32 %v1334_v41, %v7282_v42  ;;  %6176 = vmatmul.mubr.bf16.gmra.mrb[132].mxu0 %v7267_v56 }
 0x1b0   : > { %5936 = vmatmul.mubr.bf16.gmra.mrb[132].mxu1 %v7267_v56  ;;  %6179 = vmatprep.mubr.bf16.mxu0 %v7273_v61 }
 0x1b1   : > { %v7530_v18 = vadd.f32 %v1688_v45, %v1335_v0  ;;  %5939 = vmatprep.mubr.bf16.mxu1 %v7273_v61  ;;  %v7551_v45 = vld [vmem:[%s6803_s25 + $0xb8] sm:$0xff]   ;;  %v7561_v0 = vld [vmem:[%s6803_s25 + $0xc8] sm:$0xff]  }
 0x1b2   : > { %v5801_v30 = vpop.f32.mrb[92].mxu0 }
 0x1b3   : > { %v5721_v7 = vpop.f32.mrb[92].mxu1  ;;  %v1701_v8 = vpop.f32.mrb[93].mxu0  ;;  %v6715_v30 = vld [vmem:[%s6803_s25 + $0xd8] sm:$0xff]  }
 0x1b4   : > { %v1347_v62 = vpop.f32.mrb[93].mxu1  ;;  %v5802_v14 = vpop.f32.mrb[94].mxu0  ;;  %v6714_v7 = vld [vmem:[%s6803_s25 + $0xd0] sm:$0xff]  }
 0x1b5   : > { %v1348_v36 = vadd.f32 %v1347_v62, %v7290_v4  ;;  %v5722_v42 = vpop.f32.mrb[94].mxu1  ;;  %v1704_v22 = vpop.f32.mrb[95].mxu0  ;;  %v7546_v4 = vld [vmem:[%s6803_s25 + $0xb0] sm:$0xff]   ;;  %v6716_v62 = vld [vmem:[%s6803_s25 + $0xe0] sm:$0xff]  }
 0x1b6   : > { %v1350_v10 = vpop.f32.mrb[95].mxu1  ;;  %v6719_v42 = vld [vmem:[%s6803_s25 + $0xf8] sm:$0xff]  }
 0x1b7   : > { %v7535_v25 = vadd.f32 %v1701_v8, %v1348_v36  ;;  %v1351_v54 = vadd.f32 %v1350_v10, %v7294_v19  ;;  %6180 = vmatmul.mubr.bf16.gmra.mrb[136].mxu0 %v7539_v60  ;;  %v7556_v19 = vld [vmem:[%s6803_s25 + $0xc0] sm:$0xff]   ;;  %v6717_v8 = vld [vmem:[%s6803_s25 + $0xe8] sm:$0xff]   ;;  %v6718_v36 = vld [vmem:[%s6803_s25 + $0xf0] sm:$0xff]   ;;  %s5202_s25 = sshll.u32 %s7839_s12, 8 }
 0x1b8   : > { %5940 = vmatmul.mubr.bf16.gmra.mrb[136].mxu1 %v7539_v60  ;;  %6183 = vmatprep.mubr.bf16.mxu0 %v7546_v4  ;;  %s7637_s19 = scalar_lea.vmem %s7833_s3, %s5202_s25 }
 0x1b9   : > { %v7543_v41 = vadd.f32 %v1704_v22, %v1351_v54  ;;  %5943 = vmatprep.mubr.bf16.mxu1 %v7546_v4 }
 0x1bf   : > { %6184 = vmatmul.mubr.bf16.gmra.mrb[140].mxu0 %v7551_v45 }
 0x1c0   : > { %5944 = vmatmul.mubr.bf16.gmra.mrb[140].mxu1 %v7551_v45  ;;  %6187 = vmatprep.mubr.bf16.mxu0 %v7556_v19 }
 0x1c1   : > { %5947 = vmatprep.mubr.bf16.mxu1 %v7556_v19 }
 0x1c7   : > { %6188 = vmatmul.mubr.bf16.gmra.mrb[144].mxu0 %v7561_v0 }
 0x1c8   : > { %5948 = vmatmul.mubr.bf16.gmra.mrb[144].mxu1 %v7561_v0  ;;  %6191 = vmatprep.mubr.bf16.mxu0 %v6714_v7 }
 0x1c9   : > { %5951 = vmatprep.mubr.bf16.mxu1 %v6714_v7 }
 0x1cf   : > { %6192 = vmatmul.mubr.bf16.gmra.mrb[148].mxu0 %v6715_v30 }
 0x1d0   : > { %5952 = vmatmul.mubr.bf16.gmra.mrb[148].mxu1 %v6715_v30  ;;  %6195 = vmatprep.mubr.bf16.mxu0 %v6716_v62 }
 0x1d1   : > { %5955 = vmatprep.mubr.bf16.mxu1 %v6716_v62 }
 0x1d7   : > { %6196 = vmatmul.mubr.bf16.gmra.mrb[152].mxu0 %v6717_v8 }
 0x1d8   : > { %5956 = vmatmul.mubr.bf16.gmra.mrb[152].mxu1 %v6717_v8  ;;  %6199 = vmatprep.mubr.bf16.mxu0 %v6718_v36 }
 0x1d9   : > { %5959 = vmatprep.mubr.bf16.mxu1 %v6718_v36 }
 0x1df   : > { %6200 = vmatmul.mubr.bf16.gmra.mrb[156].mxu0 %v6719_v42 }
 0x1e0   : > { %5960 = vmatmul.mubr.bf16.gmra.mrb[156].mxu1 %v6719_v42  ;;  %6219 = vmatprep.mubr.bf16.mxu0 %v7387_v55 }
 0x1e1   : > { %5979 = vmatprep.mubr.bf16.mxu1 %v7387_v55  ;;  %v6723_v55 = vld [vmem:[%s6915_s18 + $0x18] sm:$0xff]  }
 0x1e7   : > { %6220 = vmatmul.mubr.bf16.vlgmr.msra.gmra.mrb[96].mxu0 %v7408_v17 }
 0x1e8   : > { %5980 = vmatmul.mubr.bf16.vlgmr.msra.gmra.mrb[96].mxu1 %v7408_v17  ;;  %6223 = vmatprep.mubr.bf16.mxu0 %v7415_v51  ;;  %v3034_v17 = vlaneseq }
 0x1e9   : > { %5983 = vmatprep.mubr.bf16.mxu1 %v7415_v51 }
 0x1ea   : > { %v7619_v51 = vshrl.u32 %v3034_v17, 7 }
 0x1ec   : > { %vm3036_vm0 = vcmp.lt.s32.totalorder %v7619_v51, 7  ;;  %vm4483_vm1 = vcmp.lt.s32.totalorder %v7619_v51, 6 }
 0x1ef   : > { %6224 = vmatmul.mubr.bf16.gmra.mrb[100].mxu0 %v7436_v43 }
 0x1f0   : > { %5984 = vmatmul.mubr.bf16.gmra.mrb[100].mxu1 %v7436_v43  ;;  %6227 = vmatprep.mubr.bf16.mxu0 %v7443_v9 }
 0x1f1   : > { %5987 = vmatprep.mubr.bf16.mxu1 %v7443_v9 }
 0x1f7   : > { %6228 = vmatmul.mubr.bf16.gmra.mrb[104].mxu0 %v7452_v59 }
 0x1f8   : > { %5988 = vmatmul.mubr.bf16.gmra.mrb[104].mxu1 %v7452_v59  ;;  %6231 = vmatprep.mubr.bf16.mxu0 %v7459_v1 }
 0x1f9   : > { %5991 = vmatprep.mubr.bf16.mxu1 %v7459_v1 }
 0x1ff   : > { %6232 = vmatmul.mubr.bf16.gmra.mrb[108].mxu0 %v7468_v26 }
 0x200   : > { %5992 = vmatmul.mubr.bf16.gmra.mrb[108].mxu1 %v7468_v26  ;;  %6235 = vmatprep.mubr.bf16.mxu0 %v7475_v48 }
 0x201   : > { %5995 = vmatprep.mubr.bf16.mxu1 %v7475_v48 }
 0x207   : > { %6236 = vmatmul.mubr.bf16.gmra.mrb[112].mxu0 %v7484_v13 }
 0x208   : > { %5996 = vmatmul.mubr.bf16.gmra.mrb[112].mxu1 %v7484_v13  ;;  %6239 = vmatprep.mubr.bf16.mxu0 %v7491_v6 }
 0x209   : > { %5999 = vmatprep.mubr.bf16.mxu1 %v7491_v6 }
 0x20f   : > { %6240 = vmatmul.mubr.bf16.gmra.mrb[116].mxu0 %v7500_v5 }
 0x210   : > { %6000 = vmatmul.mubr.bf16.gmra.mrb[116].mxu1 %v7500_v5  ;;  %6243 = vmatprep.mubr.bf16.mxu0 %v7507_v57 }
 0x211   : > { %6003 = vmatprep.mubr.bf16.mxu1 %v7507_v57 }
 0x217   : > { %6244 = vmatmul.mubr.bf16.gmra.mrb[120].mxu0 %v7516_v15 }
 0x218   : > { %6004 = vmatmul.mubr.bf16.gmra.mrb[120].mxu1 %v7516_v15  ;;  %6247 = vmatprep.mubr.bf16.mxu0 %v7254_v52 }
 0x219   : > { %6007 = vmatprep.mubr.bf16.mxu1 %v7254_v52  ;;  %v6720_v52 = vld [vmem:[%s6915_s18] sm:$0xff]  }
 0x21f   : > { %6248 = vmatmul.mubr.bf16.gmra.mrb[124].mxu0 %v7267_v56 }
 0x220   : > { %6008 = vmatmul.mubr.bf16.gmra.mrb[124].mxu1 %v7267_v56  ;;  %6251 = vmatprep.mubr.bf16.mxu0 %v7273_v61  ;;  %v6721_v56 = vld [vmem:[%s6915_s18 + $0x8] sm:$0xff]  }
 0x221   : > { %6011 = vmatprep.mubr.bf16.mxu1 %v7273_v61  ;;  %v6722_v61 = vld [vmem:[%s6915_s18 + $0x10] sm:$0xff]  }
 0x227   : > { %6252 = vmatmul.mubr.bf16.gmra.mrb[128].mxu0 %v7539_v60 }
 0x228   : > { %6012 = vmatmul.mubr.bf16.gmra.mrb[128].mxu1 %v7539_v60  ;;  %6255 = vmatprep.mubr.bf16.mxu0 %v7546_v4 }
 0x229   : > { %6015 = vmatprep.mubr.bf16.mxu1 %v7546_v4 }
 0x22f   : > { %6256 = vmatmul.mubr.bf16.gmra.mrb[132].mxu0 %v7551_v45 }
 0x230   : > { %6016 = vmatmul.mubr.bf16.gmra.mrb[132].mxu1 %v7551_v45  ;;  %6259 = vmatprep.mubr.bf16.mxu0 %v7556_v19 }
 0x231   : > { %6019 = vmatprep.mubr.bf16.mxu1 %v7556_v19 }
 0x237   : > { %6260 = vmatmul.mubr.bf16.gmra.mrb[136].mxu0 %v7561_v0 }
 0x238   : > { %6020 = vmatmul.mubr.bf16.gmra.mrb[136].mxu1 %v7561_v0  ;;  %6263 = vmatprep.mubr.bf16.mxu0 %v6714_v7 }
 0x239   : > { %6023 = vmatprep.mubr.bf16.mxu1 %v6714_v7 }
 0x23f   : > { %6264 = vmatmul.mubr.bf16.gmra.mrb[140].mxu0 %v6715_v30 }
 0x240   : > { %6024 = vmatmul.mubr.bf16.gmra.mrb[140].mxu1 %v6715_v30  ;;  %6267 = vmatprep.mubr.bf16.mxu0 %v6716_v62 }
 0x241   : > { %6027 = vmatprep.mubr.bf16.mxu1 %v6716_v62 }
 0x247   : > { %6268 = vmatmul.mubr.bf16.gmra.mrb[144].mxu0 %v6717_v8 }
 0x248   : > { %6028 = vmatmul.mubr.bf16.gmra.mrb[144].mxu1 %v6717_v8  ;;  %6271 = vmatprep.mubr.bf16.mxu0 %v6718_v36 }
 0x249   : > { %6031 = vmatprep.mubr.bf16.mxu1 %v6718_v36 }
 0x24f   : > { %6272 = vmatmul.mubr.bf16.gmra.mrb[148].mxu0 %v6719_v42 }
 0x250   : > { %6032 = vmatmul.mubr.bf16.gmra.mrb[148].mxu1 %v6719_v42  ;;  %6275 = vmatprep.mubr.bf16.mxu0 %v6720_v52 }
 0x251   : > { %6035 = vmatprep.mubr.bf16.mxu1 %v6720_v52 }
 0x257   : > { %6276 = vmatmul.mubr.bf16.gmra.mrb[152].mxu0 %v6721_v56 }
 0x258   : > { %6036 = vmatmul.mubr.bf16.gmra.mrb[152].mxu1 %v6721_v56  ;;  %6279 = vmatprep.mubr.bf16.mxu0 %v6722_v61 }
 0x259   : > { %6039 = vmatprep.mubr.bf16.mxu1 %v6722_v61 }
 0x25f   : > { %6280 = vmatmul.mubr.bf16.gmra.mrb[156].mxu0 %v6723_v55 }
 0x260   : > { %6040 = vmatmul.mubr.bf16.gmra.mrb[156].mxu1 %v6723_v55 }
 0x2ba   : > { %v6221_v9 = vpop.f32.mrb[96].mxu0 }
 0x2bb   : > { %v5981_v43 = vpop.f32.mrb[96].mxu1  ;;  %v4100_v1 = vpop.f32.mrb[97].mxu0  ;;  %v4421_v6 = vrot.slane %v6221_v9, 2 }
 0x2bc   : > { %v2651_v59 = vpop.f32.mrb[97].mxu1  ;;  %v6222_v48 = vpop.f32.mrb[98].mxu0  ;;  %v2972_v13 = vrot.slane %v5981_v43, 1  ;;  %v4419_v14 = vrot.slane %v4100_v1, 2 }
 0x2bd   : > { %v5982_v26 = vpop.f32.mrb[98].mxu1  ;;  %v4103_v57 = vpop.f32.mrb[99].mxu0  ;;  %v2970_v15 = vrot.slane %v2651_v59, 1 }
 0x2be   : > { %v2654_v5 = vpop.f32.mrb[99].mxu1  ;;  %v4420_v22 = vrot.slane %v4103_v57, 2 }
 0x2bf   : > { %v2971_v10 = vrot.slane %v2654_v5, 1 }
 0x2c0   : > { %v4545_v4 = vsel %vm4483_vm1, %v4420_v22, %v4421_v6  ;;  %v4546_v45 = vsel %vm4483_vm1, %v4419_v14, %v4420_v22 }
 0x2c1   : > { %v3098_v54 = vsel %vm3036_vm0, %v2971_v10, %v2972_v13  ;;  %v3099_v60 = vsel %vm3036_vm0, %v2970_v15, %v2971_v10 }
 0x2c2   : > { %v3165_v19 = vadd.f32 %v3099_v60, %v7301_v12  ;;  %v3166_v0 = vadd.f32 %v3098_v54, %v7306_v27  ;;  %v6225_v30 = vpop.f32.mrb[100].mxu0 }
 0x2c3   : > { %v5985_v7 = vpop.f32.mrb[100].mxu1  ;;  %v4116_v42 = vpop.f32.mrb[101].mxu0  ;;  %v4425_v27 = vrot.slane %v6225_v30, 2 }
 0x2c4   : > { %v4612_v62 = vadd.f32 %v4546_v45, %v3165_v19  ;;  %v4613_v8 = vadd.f32 %v4545_v4, %v3166_v0  ;;  %v2667_v36 = vpop.f32.mrb[101].mxu1  ;;  %v6226_v56 = vpop.f32.mrb[102].mxu0  ;;  %v2976_v55 = vrot.slane %v5985_v7, 1  ;;  %v4423_v59 = vrot.slane %v4116_v42, 2 }
 0x2c5   : > { %v5986_v52 = vpop.f32.mrb[102].mxu1  ;;  %v4119_v43 = vpop.f32.mrb[103].mxu0  ;;  %v2974_v9 = vrot.slane %v2667_v36, 1 }
 0x2c6   : > { %v4772_v61 = vmax.f32 %v4612_v62, 0.0  ;;  %v4773_v12 = vmax.f32 %v4613_v8, 0.0  ;;  %v2670_v17 = vpop.f32.mrb[103].mxu1  ;;  %v4424_v26 = vrot.slane %v4119_v43, 2 }
 0x2c7   : > { %v2975_v1 = vrot.slane %v2670_v17, 1 }
 0x2c8   : > { %4804 = vst [vmem:[%s7637_s19] sm:$0xff] %v4772_v61  ;;  %4805 = vst [vmem:[%s7637_s19 + $0x8] sm:$0xff] %v4773_v12  ;;  %v4541_v6 = vsel %vm4483_vm1, %v4424_v26, %v4425_v27  ;;  %v4542_v5 = vsel %vm4483_vm1, %v4423_v59, %v4424_v26 }
 0x2c9   : > { %v3094_v48 = vsel %vm3036_vm0, %v2975_v1, %v2976_v55  ;;  %v3095_v13 = vsel %vm3036_vm0, %v2974_v9, %v2975_v1 }
 0x2ca   : > { %v3169_v57 = vadd.f32 %v3095_v13, %v7311_v32  ;;  %v3170_v15 = vadd.f32 %v3094_v48, %v7316_v40  ;;  %v6229_v10 = vpop.f32.mrb[104].mxu0 }
 0x2cb   : > { %v5989_v14 = vpop.f32.mrb[104].mxu1  ;;  %v4132_v4 = vpop.f32.mrb[105].mxu0  ;;  %v4429_v62 = vrot.slane %v6229_v10, 2 }
 0x2cc   : > { %v4616_v22 = vadd.f32 %v4542_v5, %v3169_v57  ;;  %v4617_v54 = vadd.f32 %v4541_v6, %v3170_v15  ;;  %v2683_v60 = vpop.f32.mrb[105].mxu1  ;;  %v6230_v19 = vpop.f32.mrb[106].mxu0  ;;  %v2980_v30 = vrot.slane %v5989_v14, 1  ;;  %v4427_v32 = vrot.slane %v4132_v4, 2 }
 0x2cd   : > { %v5990_v45 = vpop.f32.mrb[106].mxu1  ;;  %v4135_v36 = vpop.f32.mrb[107].mxu0  ;;  %v2978_v42 = vrot.slane %v2683_v60, 1 }
 0x2ce   : > { %v4774_v0 = vmax.f32 %v4616_v22, 0.0  ;;  %v4775_v7 = vmax.f32 %v4617_v54, 0.0  ;;  %v2686_v8 = vpop.f32.mrb[107].mxu1  ;;  %v4428_v40 = vrot.slane %v4135_v36, 2 }
 0x2cf   : > { %v2979_v52 = vrot.slane %v2686_v8, 1 }
 0x2d0   : > { %4806 = vst [vmem:[%s7637_s19 + $0x10] sm:$0xff] %v4774_v0  ;;  %4807 = vst [vmem:[%s7637_s19 + $0x18] sm:$0xff] %v4775_v7  ;;  %v4537_v12 = vsel %vm4483_vm1, %v4428_v40, %v4429_v62  ;;  %v4538_v55 = vsel %vm4483_vm1, %v4427_v32, %v4428_v40 }
 0x2d1   : > { %v3090_v56 = vsel %vm3036_vm0, %v2979_v52, %v2980_v30  ;;  %v3091_v61 = vsel %vm3036_vm0, %v2978_v42, %v2979_v52 }
 0x2d2   : > { %v3173_v27 = vadd.f32 %v3091_v61, %v7321_v37  ;;  %v3174_v17 = vadd.f32 %v3090_v56, %v7326_v46  ;;  %v6233_v9 = vpop.f32.mrb[108].mxu0 }
 0x2d3   : > { %v5993_v43 = vpop.f32.mrb[108].mxu1  ;;  %v4148_v48 = vpop.f32.mrb[109].mxu0  ;;  %v4433_v14 = vrot.slane %v6233_v9, 2 }
 0x2d4   : > { %v4620_v59 = vadd.f32 %v4538_v55, %v3173_v27  ;;  %v4621_v1 = vadd.f32 %v4537_v12, %v3174_v17  ;;  %v2699_v26 = vpop.f32.mrb[109].mxu1  ;;  %v6234_v6 = vpop.f32.mrb[110].mxu0  ;;  %v2984_v15 = vrot.slane %v5993_v43, 1  ;;  %v4431_v37 = vrot.slane %v4148_v48, 2 }
 0x2d5   : > { %v5994_v13 = vpop.f32.mrb[110].mxu1  ;;  %v4151_v22 = vpop.f32.mrb[111].mxu0  ;;  %v2982_v54 = vrot.slane %v2699_v26, 1 }
 0x2d6   : > { %v4776_v5 = vmax.f32 %v4620_v59, 0.0  ;;  %v4777_v57 = vmax.f32 %v4621_v1, 0.0  ;;  %v2702_v10 = vpop.f32.mrb[111].mxu1  ;;  %v4432_v46 = vrot.slane %v4151_v22, 2 }
 0x2d7   : > { %v2983_v60 = vrot.slane %v2702_v10, 1 }
 0x2d8   : > { %4808 = vst [vmem:[%s7637_s19 + $0x20] sm:$0xff] %v4776_v5  ;;  %4809 = vst [vmem:[%s7637_s19 + $0x28] sm:$0xff] %v4777_v57  ;;  %v4533_v19 = vsel %vm4483_vm1, %v4432_v46, %v4433_v14  ;;  %v4534_v0 = vsel %vm4483_vm1, %v4431_v37, %v4432_v46 }
 0x2d9   : > { %v3086_v4 = vsel %vm3036_vm0, %v2983_v60, %v2984_v15  ;;  %v3087_v45 = vsel %vm3036_vm0, %v2982_v54, %v2983_v60 }
 0x2da   : > { %v3177_v7 = vadd.f32 %v3087_v45, %v7331_v35  ;;  %v3178_v30 = vadd.f32 %v3086_v4, %v7336_v39  ;;  %v6237_v8 = vpop.f32.mrb[112].mxu0 }
 0x2db   : > { %v5997_v62 = vpop.f32.mrb[112].mxu1  ;;  %v4164_v52 = vpop.f32.mrb[113].mxu0  ;;  %v4437_v27 = vrot.slane %v6237_v8, 2 }
 0x2dc   : > { %v4624_v36 = vadd.f32 %v4534_v0, %v3177_v7  ;;  %v4625_v42 = vadd.f32 %v4533_v19, %v3178_v30  ;;  %v2715_v32 = vpop.f32.mrb[113].mxu1  ;;  %v6238_v56 = vpop.f32.mrb[114].mxu0  ;;  %v2988_v55 = vrot.slane %v5997_v62, 1  ;;  %v4435_v35 = vrot.slane %v4164_v52, 2 }
 0x2dd   : > { %v5998_v40 = vpop.f32.mrb[114].mxu1  ;;  %v4167_v43 = vpop.f32.mrb[115].mxu0  ;;  %v2986_v9 = vrot.slane %v2715_v32, 1 }
 0x2de   : > { %v4778_v61 = vmax.f32 %v4624_v36, 0.0  ;;  %v4779_v12 = vmax.f32 %v4625_v42, 0.0  ;;  %v2718_v17 = vpop.f32.mrb[115].mxu1  ;;  %v4436_v39 = vrot.slane %v4167_v43, 2 }
 0x2df   : > { %v2987_v59 = vrot.slane %v2718_v17, 1 }
 0x2e0   : > { %4810 = vst [vmem:[%s7637_s19 + $0x30] sm:$0xff] %v4778_v61  ;;  %4811 = vst [vmem:[%s7637_s19 + $0x38] sm:$0xff] %v4779_v12  ;;  %v4529_v48 = vsel %vm4483_vm1, %v4436_v39, %v4437_v27  ;;  %v4530_v13 = vsel %vm4483_vm1, %v4435_v35, %v4436_v39 }
 0x2e1   : > { %v3082_v1 = vsel %vm3036_vm0, %v2987_v59, %v2988_v55  ;;  %v3083_v26 = vsel %vm3036_vm0, %v2986_v9, %v2987_v59 }
 0x2e2   : > { %v3181_v6 = vadd.f32 %v3083_v26, %v7341_v31  ;;  %v3182_v5 = vadd.f32 %v3082_v1, %v7346_v3  ;;  %v6241_v15 = vpop.f32.mrb[116].mxu0 }
 0x2e3   : > { %v6001_v57 = vpop.f32.mrb[116].mxu1  ;;  %v4180_v54 = vpop.f32.mrb[117].mxu0  ;;  %v4441_v19 = vrot.slane %v6241_v15, 2 }
 0x2e4   : > { %v4628_v14 = vadd.f32 %v4530_v13, %v3181_v6  ;;  %v4629_v10 = vadd.f32 %v4529_v48, %v3182_v5  ;;  %v2731_v22 = vpop.f32.mrb[117].mxu1  ;;  %v6242_v60 = vpop.f32.mrb[118].mxu0  ;;  %v2992_v45 = vrot.slane %v6001_v57, 1  ;;  %v4439_v31 = vrot.slane %v4180_v54, 2 }
 0x2e5   : > { %v6002_v37 = vpop.f32.mrb[118].mxu1  ;;  %v4183_v7 = vpop.f32.mrb[119].mxu0  ;;  %v2990_v30 = vrot.slane %v2731_v22, 1 }
 0x2e6   : > { %v4780_v46 = vmax.f32 %v4628_v14, 0.0  ;;  %v4781_v4 = vmax.f32 %v4629_v10, 0.0  ;;  %v2734_v0 = vpop.f32.mrb[119].mxu1  ;;  %v4440_v3 = vrot.slane %v4183_v7, 2 }
 0x2e7   : > { %v2991_v62 = vrot.slane %v2734_v0, 1 }
 0x2e8   : > { %4812 = vst [vmem:[%s7637_s19 + $0x40] sm:$0xff] %v4780_v46  ;;  %4813 = vst [vmem:[%s7637_s19 + $0x48] sm:$0xff] %v4781_v4  ;;  %v4525_v42 = vsel %vm4483_vm1, %v4440_v3, %v4441_v19  ;;  %v4526_v32 = vsel %vm4483_vm1, %v4439_v31, %v4440_v3 }
 0x2e9   : > { %v3078_v8 = vsel %vm3036_vm0, %v2991_v62, %v2992_v45  ;;  %v3079_v36 = vsel %vm3036_vm0, %v2990_v30, %v2991_v62 }
 0x2ea   : > { %v3185_v52 = vadd.f32 %v3079_v36, %v7351_v23  ;;  %v3186_v40 = vadd.f32 %v3078_v8, %v7362_v33  ;;  %v6245_v61 = vpop.f32.mrb[120].mxu0 }
 0x2eb   : > { %v6005_v56 = vpop.f32.mrb[120].mxu1  ;;  %v4196_v17 = vpop.f32.mrb[121].mxu0  ;;  %v4445_v1 = vrot.slane %v6245_v61, 2 }
 0x2ec   : > { %v4632_v12 = vadd.f32 %v4526_v32, %v3185_v52  ;;  %v4633_v55 = vadd.f32 %v4525_v42, %v3186_v40  ;;  %v2747_v27 = vpop.f32.mrb[121].mxu1  ;;  %v6246_v9 = vpop.f32.mrb[122].mxu0  ;;  %v2996_v39 = vrot.slane %v6005_v56, 1  ;;  %v4443_v23 = vrot.slane %v4196_v17, 2 }
 0x2ed   : > { %v6006_v43 = vpop.f32.mrb[122].mxu1  ;;  %v4199_v48 = vpop.f32.mrb[123].mxu0  ;;  %v2994_v13 = vrot.slane %v2747_v27, 1 }
 0x2ee   : > { %v4782_v35 = vmax.f32 %v4632_v12, 0.0  ;;  %v4783_v59 = vmax.f32 %v4633_v55, 0.0  ;;  %v2750_v26 = vpop.f32.mrb[123].mxu1  ;;  %v4444_v33 = vrot.slane %v4199_v48, 2 }
 0x2ef   : > { %v2995_v6 = vrot.slane %v2750_v26, 1 }
 0x2f0   : > { %4814 = vst [vmem:[%s7637_s19 + $0x50] sm:$0xff] %v4782_v35  ;;  %4815 = vst [vmem:[%s7637_s19 + $0x58] sm:$0xff] %v4783_v59  ;;  %v4521_v15 = vsel %vm4483_vm1, %v4444_v33, %v4445_v1  ;;  %v4522_v14 = vsel %vm4483_vm1, %v4443_v23, %v4444_v33 }
 0x2f1   : > { %v3074_v5 = vsel %vm3036_vm0, %v2995_v6, %v2996_v39  ;;  %v3075_v57 = vsel %vm3036_vm0, %v2994_v13, %v2995_v6 }
 0x2f2   : > { %v3189_v10 = vadd.f32 %v3075_v57, %v7374_v38  ;;  %v3190_v22 = vadd.f32 %v3074_v5, %v7384_v53  ;;  %v6249_v37 = vpop.f32.mrb[124].mxu0 }
 0x2f3   : > { %v6009_v54 = vpop.f32.mrb[124].mxu1  ;;  %v4212_v45 = vpop.f32.mrb[125].mxu0  ;;  %v4449_v62 = vrot.slane %v6249_v37, 2 }
 0x2f4   : > { %v4636_v60 = vadd.f32 %v4522_v14, %v3189_v10  ;;  %v4637_v46 = vadd.f32 %v4521_v15, %v3190_v22  ;;  %v2763_v4 = vpop.f32.mrb[125].mxu1  ;;  %v6250_v0 = vpop.f32.mrb[126].mxu0  ;;  %v3000_v31 = vrot.slane %v6009_v54, 1  ;;  %v4447_v38 = vrot.slane %v4212_v45, 2 }
 0x2f5   : > { %v6010_v19 = vpop.f32.mrb[126].mxu1  ;;  %v4215_v8 = vpop.f32.mrb[127].mxu0  ;;  %v2998_v36 = vrot.slane %v2763_v4, 1 }
 0x2f6   : > { %v4784_v7 = vmax.f32 %v4636_v60, 0.0  ;;  %v4785_v30 = vmax.f32 %v4637_v46, 0.0  ;;  %v2766_v3 = vpop.f32.mrb[127].mxu1  ;;  %v4448_v53 = vrot.slane %v4215_v8, 2 }
 0x2f7   : > { %v2999_v42 = vrot.slane %v2766_v3, 1 }
 0x2f8   : > { %4816 = vst [vmem:[%s7637_s19 + $0x60] sm:$0xff] %v4784_v7  ;;  %4817 = vst [vmem:[%s7637_s19 + $0x68] sm:$0xff] %v4785_v30  ;;  %v4517_v40 = vsel %vm4483_vm1, %v4448_v53, %v4449_v62  ;;  %v4518_v56 = vsel %vm4483_vm1, %v4447_v38, %v4448_v53 }
 0x2f9   : > { %v3070_v32 = vsel %vm3036_vm0, %v2999_v42, %v3000_v31  ;;  %v3071_v52 = vsel %vm3036_vm0, %v2998_v36, %v2999_v42 }
 0x2fa   : > { %v3193_v61 = vadd.f32 %v3071_v52, %v7398_v58  ;;  %v3194_v12 = vadd.f32 %v3070_v32, %v7412_v49  ;;  %v6253_v27 = vpop.f32.mrb[128].mxu0 }
 0x2fb   : > { %v6013_v55 = vpop.f32.mrb[128].mxu1  ;;  %v4228_v35 = vpop.f32.mrb[129].mxu0  ;;  %v4453_v13 = vrot.slane %v6253_v27, 2 }
 0x2fc   : > { %v4640_v17 = vadd.f32 %v4518_v56, %v3193_v61  ;;  %v4641_v43 = vadd.f32 %v4517_v40, %v3194_v12  ;;  %v2779_v9 = vpop.f32.mrb[129].mxu1  ;;  %v6254_v39 = vpop.f32.mrb[130].mxu0  ;;  %v3004_v48 = vrot.slane %v6013_v55, 1  ;;  %v4451_v58 = vrot.slane %v4228_v35, 2 }
 0x2fd   : > { %v6014_v59 = vpop.f32.mrb[130].mxu1  ;;  %v4231_v6 = vpop.f32.mrb[131].mxu0  ;;  %v3002_v33 = vrot.slane %v2779_v9, 1 }
 0x2fe   : > { %v4786_v1 = vmax.f32 %v4640_v17, 0.0  ;;  %v4787_v26 = vmax.f32 %v4641_v43, 0.0  ;;  %v2782_v23 = vpop.f32.mrb[131].mxu1  ;;  %v4452_v49 = vrot.slane %v4231_v6, 2 }
 0x2ff   : > { %v3003_v5 = vrot.slane %v2782_v23, 1 }
 0x300   : > { %4818 = vst [vmem:[%s7637_s19 + $0x70] sm:$0xff] %v4786_v1  ;;  %4819 = vst [vmem:[%s7637_s19 + $0x78] sm:$0xff] %v4787_v26  ;;  %v4513_v14 = vsel %vm4483_vm1, %v4452_v49, %v4453_v13  ;;  %v4514_v10 = vsel %vm4483_vm1, %v4451_v58, %v4452_v49 }
 0x301   : > { %v3066_v57 = vsel %vm3036_vm0, %v3003_v5, %v3004_v48  ;;  %v3067_v15 = vsel %vm3036_vm0, %v3002_v33, %v3003_v5 }
 0x302   : > { %v3197_v22 = vadd.f32 %v3067_v15, %v7426_v24  ;;  %v3198_v54 = vadd.f32 %v3066_v57, %v7440_v47  ;;  %v6257_v60 = vpop.f32.mrb[132].mxu0 }
 0x303   : > { %v6017_v37 = vpop.f32.mrb[132].mxu1  ;;  %v4244_v19 = vpop.f32.mrb[133].mxu0  ;;  %v4457_v3 = vrot.slane %v6257_v60, 2 }
 0x304   : > { %v4644_v46 = vadd.f32 %v4514_v10, %v3197_v22  ;;  %v4645_v4 = vadd.f32 %v4513_v14, %v3198_v54  ;;  %v2795_v45 = vpop.f32.mrb[133].mxu1  ;;  %v6258_v7 = vpop.f32.mrb[134].mxu0  ;;  %v3008_v62 = vrot.slane %v6017_v37, 1  ;;  %v4455_v24 = vrot.slane %v4244_v19, 2 }
 0x305   : > { %v6018_v0 = vpop.f32.mrb[134].mxu1  ;;  %v4247_v36 = vpop.f32.mrb[135].mxu0  ;;  %v3006_v38 = vrot.slane %v2795_v45, 1 }
 0x306   : > { %v4788_v30 = vmax.f32 %v4644_v46, 0.0  ;;  %v4789_v31 = vmax.f32 %v4645_v4, 0.0  ;;  %v2798_v8 = vpop.f32.mrb[135].mxu1  ;;  %v4456_v47 = vrot.slane %v4247_v36, 2 }
 0x307   : > { %v3007_v42 = vrot.slane %v2798_v8, 1 }
 0x308   : > { %4820 = vst [vmem:[%s7637_s19 + $0x80] sm:$0xff] %v4788_v30  ;;  %4821 = vst [vmem:[%s7637_s19 + $0x88] sm:$0xff] %v4789_v31  ;;  %v4509_v52 = vsel %vm4483_vm1, %v4456_v47, %v4457_v3  ;;  %v4510_v40 = vsel %vm4483_vm1, %v4455_v24, %v4456_v47 }
 0x309   : > { %v3062_v53 = vsel %vm3036_vm0, %v3007_v42, %v3008_v62  ;;  %v3063_v32 = vsel %vm3036_vm0, %v3006_v38, %v3007_v42 }
 0x30a   : > { %v3201_v56 = vadd.f32 %v3063_v32, %v7448_v20  ;;  %v3202_v61 = vadd.f32 %v3062_v53, %v7456_v63  ;;  %v6261_v55 = vpop.f32.mrb[136].mxu0 }
 0x30b   : > { %v6021_v12 = vpop.f32.mrb[136].mxu1  ;;  %v4260_v9 = vpop.f32.mrb[137].mxu0  ;;  %v4461_v48 = vrot.slane %v6261_v55, 2 }
 0x30c   : > { %v4648_v27 = vadd.f32 %v4510_v40, %v3201_v56  ;;  %v4649_v17 = vadd.f32 %v4509_v52, %v3202_v61  ;;  %v2811_v43 = vpop.f32.mrb[137].mxu1  ;;  %v6262_v59 = vpop.f32.mrb[138].mxu0  ;;  %v3012_v26 = vrot.slane %v6021_v12, 1  ;;  %v4459_v20 = vrot.slane %v4260_v9, 2 }
 0x30d   : > { %v6022_v35 = vpop.f32.mrb[138].mxu1  ;;  %v4263_v23 = vpop.f32.mrb[139].mxu0  ;;  %v3010_v6 = vrot.slane %v2811_v43, 1 }
 0x30e   : > { %v4790_v39 = vmax.f32 %v4648_v27, 0.0  ;;  %v4791_v1 = vmax.f32 %v4649_v17, 0.0  ;;  %v2814_v13 = vpop.f32.mrb[139].mxu1  ;;  %v4460_v63 = vrot.slane %v4263_v23, 2 }
 0x30f   : > { %v3011_v33 = vrot.slane %v2814_v13, 1 }
 0x310   : > { %4822 = vst [vmem:[%s7637_s19 + $0x90] sm:$0xff] %v4790_v39  ;;  %4823 = vst [vmem:[%s7637_s19 + $0x98] sm:$0xff] %v4791_v1  ;;  %v4505_v49 = vsel %vm4483_vm1, %v4460_v63, %v4461_v48  ;;  %v4506_v57 = vsel %vm4483_vm1, %v4459_v20, %v4460_v63 }
 0x311   : > { %v3058_v58 = vsel %vm3036_vm0, %v3011_v33, %v3012_v26  ;;  %v3059_v5 = vsel %vm3036_vm0, %v3010_v6, %v3011_v33 }
 0x312   : > { %v3205_v15 = vadd.f32 %v3059_v5, %v7464_v16  ;;  %v3206_v14 = vadd.f32 %v3058_v58, %v7472_v44  ;;  %v6265_v22 = vpop.f32.mrb[140].mxu0 }
 0x313   : > { %v6025_v10 = vpop.f32.mrb[140].mxu1  ;;  %v4276_v46 = vpop.f32.mrb[141].mxu0  ;;  %v4465_v30 = vrot.slane %v6265_v22, 2 }
 0x314   : > { %v4652_v54 = vadd.f32 %v4506_v57, %v3205_v15  ;;  %v4653_v37 = vadd.f32 %v4505_v49, %v3206_v14  ;;  %v2827_v60 = vpop.f32.mrb[141].mxu1  ;;  %v6266_v45 = vpop.f32.mrb[142].mxu0  ;;  %v3016_v7 = vrot.slane %v6025_v10, 1  ;;  %v4463_v16 = vrot.slane %v4276_v46, 2 }
 0x315   : > { %v6026_v4 = vpop.f32.mrb[142].mxu1  ;;  %v4279_v62 = vpop.f32.mrb[143].mxu0  ;;  %v3014_v3 = vrot.slane %v2827_v60, 1 }
 0x316   : > { %v4792_v19 = vmax.f32 %v4652_v54, 0.0  ;;  %v4793_v0 = vmax.f32 %v4653_v37, 0.0  ;;  %v2830_v31 = vpop.f32.mrb[143].mxu1  ;;  %v4464_v44 = vrot.slane %v4279_v62, 2 }
 0x317   : > { %v3015_v8 = vrot.slane %v2830_v31, 1 }
 0x318   : > { %4824 = vst [vmem:[%s7637_s19 + $0xa0] sm:$0xff] %v4792_v19  ;;  %4825 = vst [vmem:[%s7637_s19 + $0xa8] sm:$0xff] %v4793_v0  ;;  %v4501_v24 = vsel %vm4483_vm1, %v4464_v44, %v4465_v30  ;;  %v4502_v42 = vsel %vm4483_vm1, %v4463_v16, %v4464_v44 }
 0x319   : > { %v3054_v36 = vsel %vm3036_vm0, %v3015_v8, %v3016_v7  ;;  %v3055_v38 = vsel %vm3036_vm0, %v3014_v3, %v3015_v8 }
 0x31a   : > { %v3209_v47 = vadd.f32 %v3055_v38, %v7480_v28  ;;  %v3210_v53 = vadd.f32 %v3054_v36, %v7488_v34  ;;  %v6269_v52 = vpop.f32.mrb[144].mxu0 }
 0x31b   : > { %v6029_v32 = vpop.f32.mrb[144].mxu1  ;;  %v4292_v12 = vpop.f32.mrb[145].mxu0  ;;  %v4469_v35 = vrot.slane %v6269_v52, 2 }
 0x31c   : > { %v4656_v40 = vadd.f32 %v4502_v42, %v3209_v47  ;;  %v4657_v56 = vadd.f32 %v4501_v24, %v3210_v53  ;;  %v2843_v61 = vpop.f32.mrb[145].mxu1  ;;  %v6270_v27 = vpop.f32.mrb[146].mxu0  ;;  %v3020_v9 = vrot.slane %v6029_v32, 1  ;;  %v4467_v28 = vrot.slane %v4292_v12, 2 }
 0x31d   : > { %v6030_v55 = vpop.f32.mrb[146].mxu1  ;;  %v4295_v39 = vpop.f32.mrb[147].mxu0  ;;  %v3018_v1 = vrot.slane %v2843_v61, 1 }
 0x31e   : > { %v4794_v17 = vmax.f32 %v4656_v40, 0.0  ;;  %v4795_v43 = vmax.f32 %v4657_v56, 0.0  ;;  %v2846_v59 = vpop.f32.mrb[147].mxu1  ;;  %v4468_v34 = vrot.slane %v4295_v39, 2 }
 0x31f   : > { %v3019_v26 = vrot.slane %v2846_v59, 1 }
 0x320   : > { %4826 = vst [vmem:[%s7637_s19 + $0xb0] sm:$0xff] %v4794_v17  ;;  %4827 = vst [vmem:[%s7637_s19 + $0xb8] sm:$0xff] %v4795_v43  ;;  %v4497_v23 = vsel %vm4483_vm1, %v4468_v34, %v4469_v35  ;;  %v4498_v6 = vsel %vm4483_vm1, %v4467_v28, %v4468_v34 }
 0x321   : > { %v3050_v48 = vsel %vm3036_vm0, %v3019_v26, %v3020_v9  ;;  %v3051_v13 = vsel %vm3036_vm0, %v3018_v1, %v3019_v26 }
 0x322   : > { %v3213_v20 = vadd.f32 %v3051_v13, %v7496_v50  ;;  %v3214_v33 = vadd.f32 %v3050_v48, %v7504_v21  ;;  %v6273_v58 = vpop.f32.mrb[148].mxu0 }
 0x323   : > { %v6033_v63 = vpop.f32.mrb[148].mxu1  ;;  %v4308_v15 = vpop.f32.mrb[149].mxu0  ;;  %v4473_v60 = vrot.slane %v6273_v58, 2 }
 0x324   : > { %v4660_v5 = vadd.f32 %v4498_v6, %v3213_v20  ;;  %v4661_v49 = vadd.f32 %v4497_v23, %v3214_v33  ;;  %v2859_v57 = vpop.f32.mrb[149].mxu1  ;;  %v6274_v10 = vpop.f32.mrb[150].mxu0  ;;  %v3024_v37 = vrot.slane %v6033_v63, 1  ;;  %v4471_v50 = vrot.slane %v4308_v15, 2 }
 0x325   : > { %v6034_v14 = vpop.f32.mrb[150].mxu1  ;;  %v4311_v4 = vpop.f32.mrb[151].mxu0  ;;  %v3022_v45 = vrot.slane %v2859_v57, 1 }
 0x326   : > { %v4796_v22 = vmax.f32 %v4660_v5, 0.0  ;;  %v4797_v54 = vmax.f32 %v4661_v49, 0.0  ;;  %v2862_v46 = vpop.f32.mrb[151].mxu1  ;;  %v4472_v21 = vrot.slane %v4311_v4, 2 }
 0x327   : > { %v3023_v19 = vrot.slane %v2862_v46, 1 }
 0x328   : > { %4828 = vst [vmem:[%s7637_s19 + $0xc0] sm:$0xff] %v4796_v22  ;;  %4829 = vst [vmem:[%s7637_s19 + $0xc8] sm:$0xff] %v4797_v54  ;;  %v4493_v30 = vsel %vm4483_vm1, %v4472_v21, %v4473_v60  ;;  %v4494_v31 = vsel %vm4483_vm1, %v4471_v50, %v4472_v21 }
 0x329   : > { %v3046_v0 = vsel %vm3036_vm0, %v3023_v19, %v3024_v37  ;;  %v3047_v7 = vsel %vm3036_vm0, %v3022_v45, %v3023_v19 }
 0x32a   : > { %v3217_v62 = vadd.f32 %v3047_v7, %v7512_v11  ;;  %v3218_v3 = vadd.f32 %v3046_v0, %v7520_v2  ;;  %v6277_v8 = vpop.f32.mrb[152].mxu0 }
 0x32b   : > { %v6037_v16 = vpop.f32.mrb[152].mxu1  ;;  %v4324_v24 = vpop.f32.mrb[153].mxu0  ;;  %v4477_v40 = vrot.slane %v6277_v8, 2 }
 0x32c   : > { %v4664_v44 = vadd.f32 %v4494_v31, %v3217_v62  ;;  %v4665_v36 = vadd.f32 %v4493_v30, %v3218_v3  ;;  %v2875_v38 = vpop.f32.mrb[153].mxu1  ;;  %v6278_v47 = vpop.f32.mrb[154].mxu0  ;;  %v3028_v52 = vrot.slane %v6037_v16, 1  ;;  %v4475_v11 = vrot.slane %v4324_v24, 2 }
 0x32d   : > { %v6038_v42 = vpop.f32.mrb[154].mxu1  ;;  %v4327_v61 = vpop.f32.mrb[155].mxu0  ;;  %v3026_v12 = vrot.slane %v2875_v38, 1 }
 0x32e   : > { %v4798_v53 = vmax.f32 %v4664_v44, 0.0  ;;  %v4799_v32 = vmax.f32 %v4665_v36, 0.0  ;;  %v2878_v56 = vpop.f32.mrb[155].mxu1  ;;  %v4476_v2 = vrot.slane %v4327_v61, 2 }
 0x32f   : > { %v3027_v55 = vrot.slane %v2878_v56, 1 }
 0x330   : > { %4830 = vst [vmem:[%s7637_s19 + $0xd0] sm:$0xff] %v4798_v53  ;;  %4831 = vst [vmem:[%s7637_s19 + $0xd8] sm:$0xff] %v4799_v32  ;;  %v4489_v43 = vsel %vm4483_vm1, %v4476_v2, %v4477_v40  ;;  %v4490_v9 = vsel %vm4483_vm1, %v4475_v11, %v4476_v2 }
 0x331   : > { %v3042_v27 = vsel %vm3036_vm0, %v3027_v55, %v3028_v52  ;;  %v3043_v17 = vsel %vm3036_vm0, %v3026_v12, %v3027_v55 }
 0x332   : > { %v3221_v35 = vadd.f32 %v3043_v17, %v7525_v29  ;;  %v3222_v59 = vadd.f32 %v3042_v27, %v7530_v18  ;;  %v6281_v1 = vpop.f32.mrb[156].mxu0 }
 0x333   : > { %v6041_v39 = vpop.f32.mrb[156].mxu1  ;;  %v4340_v48 = vpop.f32.mrb[157].mxu0  ;;  %v4481_v63 = vrot.slane %v6281_v1, 2 }
 0x334   : > { %v4668_v28 = vadd.f32 %v4490_v9, %v3221_v35  ;;  %v4669_v26 = vadd.f32 %v4489_v43, %v3222_v59  ;;  %v2891_v34 = vpop.f32.mrb[157].mxu1  ;;  %v6282_v23 = vpop.f32.mrb[158].mxu0  ;;  %v3032_v33 = vrot.slane %v6041_v39, 1  ;;  %v4479_v29 = vrot.slane %v4340_v48, 2 }
 0x335   : > { %v6042_v13 = vpop.f32.mrb[158].mxu1  ;;  %v4343_v5 = vpop.f32.mrb[159].mxu0  ;;  %v3030_v49 = vrot.slane %v2891_v34, 1 }
 0x336   : > { %v4800_v6 = vmax.f32 %v4668_v28, 0.0  ;;  %v4801_v20 = vmax.f32 %v4669_v26, 0.0  ;;  %v2894_v58 = vpop.f32.mrb[159].mxu1  ;;  %v4480_v57 = vrot.slane %v4343_v5, 2 }
 0x337   : > { %v3031_v18 = vrot.slane %v2894_v58, 1 }
 0x338   : > { %4832 = vst [vmem:[%s7637_s19 + $0xe0] sm:$0xff] %v4800_v6  ;;  %4833 = vst [vmem:[%s7637_s19 + $0xe8] sm:$0xff] %v4801_v20  ;;  %v4485_v10 = vsel %vm4483_vm1, %v4480_v57, %v4481_v63  ;;  %v4486_v22 = vsel %vm4483_vm1, %v4479_v29, %v4480_v57 }
 0x339   : > { %v3038_v15 = vsel %vm3036_vm0, %v3031_v18, %v3032_v33  ;;  %v3039_v14 = vsel %vm3036_vm0, %v3030_v49, %v3031_v18 }
 0x33a   : > { %v3225_v54 = vadd.f32 %v3039_v14, %v7535_v25  ;;  %v3226_v37 = vadd.f32 %v3038_v15, %v7543_v41 }
 0x33c   : > { %v4672_v60 = vadd.f32 %v4486_v22, %v3225_v54  ;;  %v4673_v46 = vadd.f32 %v4485_v10, %v3226_v37 }
 0x33e   : > { %v4802_v4 = vmax.f32 %v4672_v60, 0.0  ;;  %v4803_v45 = vmax.f32 %v4673_v46, 0.0 }
 0x340   : > { %4834 = vst [vmem:[%s7637_s19 + $0xf0] sm:$0xff] %v4802_v4  ;;  %4835 = vst [vmem:[%s7637_s19 + $0xf8] sm:$0xff] %v4803_v45 }
 0x341 PF: > { %s13_s14 = sadd.s32 1, %s6746_s14   ;;  %s7834_s12 = smov %s6742_s13 }
 0x342   : > { %p10_p5 = scmp.ge.s32.totalorder %s13_s14, 4   ;;  %s7835_s13 = smov %s7837_s15 }
 0x344   :  { %12 = sbr.rel (!%p10_p5) target bundleno = 2 (0x2), region = 74 }

</bundles_post_ra>
